<compile_context>
chip_gen: v5e
topology: v5e:2x2
jax: 0.10.0
libtpu: 0.0.40
codegen_flags: <defaults>
</compile_context>

<pallas_src>
import jax
import jax.numpy as jnp
from jax.experimental import pallas as pl
from jax.experimental.pallas import tpu as pltpu

# ----------------------------- configuration -------------------------------
N_NODES = 16
IN_CHANNELS = 16
HIDDEN = 64
HEADS = 8
DHEAD = HIDDEN // HEADS      # 8
OUT_CHANNELS = 3
LN_EPS = 1e-5
NEG_SLOPE = 0.2
NEG_BIG = -1e30


# ------------------------------- kernel ------------------------------------
def heterogat_kernel(x_ref, bias_ref, maskf_ref, diag_ref, eexp_ref, ered_ref, bmask_ref,
                     w1_ref, b1_ref, asb1_ref, adb1_ref, g1_ref, be1_ref,
                     w2_ref, b2_ref, asb2_ref, adb2_ref, g2_ref, be2_ref,
                     w3_ref, b3_ref, asb3_ref, adb3_ref, g3_ref, be3_ref,
                     wl_ref, bl_ref,
                     out_ref):
    x = x_ref[...]
    bias_big = bias_ref[...]    # [N, H*N] additive edge mask (0 on edge, -1e30 off)
    maskf_big = maskf_ref[...]  # [N, H*N] multiplicative edge mask (zero-in-degree guard)
    diag_mask = diag_ref[...]   # [N, H*N] delta(j, j') per head block
    e_exp = eexp_ref[...]       # [H,   H*N] head -> per-head lane-block expansion
    e_red = ered_ref[...]       # [H*N, H  ] per-head lane-block -> head reduction
    blockmask = bmask_ref[...]  # [H*N, HIDDEN] block-diagonal selector

    def han_layer(h_in, w_ref, b_ref, asb_ref, adb_ref):
        # node-type projection (MXU)
        h = jnp.dot(h_in, w_ref[...], preferred_element_type=jnp.float32) + b_ref[...]

        # All per-head attention scores as two MXU matmuls (packed + pre-expanded).
        #   src_tmp[j, h*N+j'] = alpha_src[j, h]  -> keep j'=j, fold rows
        src_tmp = jnp.dot(h, asb_ref[...], preferred_element_type=jnp.float32) * diag_mask
        src_row = jnp.sum(src_tmp, axis=0, keepdims=True)          # [1, H*N]: alpha_src[j,h]
        dst_big = jnp.dot(h, adb_ref[...], preferred_element_type=jnp.float32)  # [N, H*N]: alpha_dst[i,h]

        e = dst_big + src_row                       # e[i, h*N+j] = a_dst[i,h] + a_src[j,h]
        e = jnp.maximum(e, NEG_SLOPE * e)           # leaky_relu (single VALU op)
        e = e + bias_big                            # edges only (additive mask)

        # Row max shared across heads: a valid softmax shift (cancels per head),
        # avoids a per-head segmented reduce; score magnitudes are O(1) so no
        # per-head underflow is possible.
        m = jnp.max(e, axis=1, keepdims=True)
        p = jnp.exp(e - m) * maskf_big              # off-edges exactly 0

        den = jnp.dot(p, e_red, preferred_element_type=jnp.float32)      # [N, H] per-head sums
        inv = pl.reciprocal(jnp.where(den > 0.0, den, 1.0), approx=True)  # EUP; rows w/o edges -> 0
        inv_big = jnp.dot(inv, e_exp, preferred_element_type=jnp.float32)  # [N, H*N]
        attn = p * inv_big

        # Block-diagonal V: one [N,H*N] x [H*N,HIDDEN] (K=128) matmul yields the
        # already-concatenated per-head outputs.
        v_big = jnp.concatenate([h] * HEADS, axis=0) * blockmask          # [H*N, HIDDEN]
        out = jnp.dot(attn, v_big, preferred_element_type=jnp.float32)    # [N, HIDDEN]
        return jnp.maximum(out, 0.0)                                      # relu

    def layer_norm(h, g_ref, be_ref):
        mean = jnp.mean(h, axis=1, keepdims=True)
        var = jnp.mean((h - mean) ** 2, axis=1, keepdims=True)
        return (h - mean) * jax.lax.rsqrt(var + LN_EPS) * g_ref[...] + be_ref[...]

    h = layer_norm(han_layer(x, w1_ref, b1_ref, asb1_ref, adb1_ref), g1_ref, be1_ref)
    h = layer_norm(han_layer(h, w2_ref, b2_ref, asb2_ref, adb2_ref), g2_ref, be2_ref)
    h = layer_norm(han_layer(h, w3_ref, b3_ref, asb3_ref, adb3_ref), g3_ref, be3_ref)

    # final Linear + softmax over classes (exact divide keeps probs summing to 1)
    logits = jnp.dot(h, wl_ref[...], preferred_element_type=jnp.float32) + bl_ref[...]
    logits = logits - jnp.max(logits, axis=1, keepdims=True)
    pz = jnp.exp(logits)
    out_ref[...] = pz / jnp.sum(pz, axis=1, keepdims=True)


# ------------------------------- wrapper ------------------------------------
def _pack_attention(a_src, a_dst, n):
    """[HEADS, DHEAD] score vectors -> pre-expanded [HIDDEN, HEADS*n] matrices.

    A_big[c, h*n + j] = a[h, c - h*DHEAD] if h*DHEAD <= c < (h+1)*DHEAD else 0,
    so h @ A_big gives alpha[h-index] replicated across each head's n lanes.
    """
    eye_h = jnp.eye(HEADS, dtype=jnp.float32)
    a_src_pack = jnp.einsum("hd,hk->hdk", a_src, eye_h).reshape(HIDDEN, HEADS)
    a_dst_pack = jnp.einsum("hd,hk->hdk", a_dst, eye_h).reshape(HIDDEN, HEADS)
    e_exp = jnp.kron(eye_h, jnp.ones((1, n), jnp.float32))   # [H, H*n]
    return a_src_pack @ e_exp, a_dst_pack @ e_exp


@jax.jit
def heterogat_forward(x, edge_index, params):
    n = x.shape[0]
    src = edge_index[0]
    dst = edge_index[1]

    # dense adjacency -> additive bias + multiplicative mask, tiled per head
    adj = jnp.zeros((n, n), jnp.float32).at[dst, src].set(1.0)
    on_edge = adj > 0.0
    bias_big = jnp.tile(jnp.where(on_edge, 0.0, NEG_BIG).astype(jnp.float32), (1, HEADS))
    maskf_big = jnp.tile(on_edge.astype(jnp.float32), (1, HEADS))

    # structural constants (head-block expansion / reduction / selection)
    eye_h = jnp.eye(HEADS, dtype=jnp.float32)
    diag_mask = jnp.tile(jnp.eye(n, dtype=jnp.float32), (1, HEADS))          # [n, H*n]
    e_exp = jnp.kron(eye_h, jnp.ones((1, n), jnp.float32))                   # [H, H*n]
    e_red = e_exp.T                                                          # [H*n, H]
    blockmask = jnp.kron(eye_h, jnp.ones((n, DHEAD), jnp.float32))           # [H*n, HIDDEN]

    asb1, adb1 = _pack_attention(params["as1"], params["ad1"], n)
    asb2, adb2 = _pack_attention(params["as2"], params["ad2"], n)
    asb3, adb3 = _pack_attention(params["as3"], params["ad3"], n)

    args = [
        x.astype(jnp.float32), bias_big, maskf_big, diag_mask, e_exp, e_red, blockmask,
        params["w1"], params["b1"], asb1, adb1, params["g1"], params["be1"],
        params["w2"], params["b2"], asb2, adb2, params["g2"], params["be2"],
        params["w3"], params["b3"], asb3, adb3, params["g3"], params["be3"],
        params["wl"], params["bl"],
    ]
    vmem_specs = [pl.BlockSpec(memory_space=pltpu.MemorySpace.VMEM) for _ in args]

    return pl.pallas_call(
        heterogat_kernel,
        out_shape=jax.ShapeDtypeStruct((n, OUT_CHANNELS), jnp.float32),
        in_specs=vmem_specs,
        out_specs=pl.BlockSpec(memory_space=pltpu.MemorySpace.VMEM),
    )(*args)


# --------------------------- parameter creation ------------------------------
def init_params(key):
    params = {}

    def dense(k, fan_in, shape):
        return jax.random.normal(k, shape, jnp.float32) / jnp.sqrt(jnp.float32(fan_in))

    keys = jax.random.split(key, 32)
    ki = iter(range(32))

    # conv1: in -> hidden
    params["w1"] = dense(keys[next(ki)], IN_CHANNELS, (IN_CHANNELS, HIDDEN))
    params["b1"] = jnp.zeros((1, HIDDEN), jnp.float32)
    params["as1"] = dense(keys[next(ki)], DHEAD, (HEADS, DHEAD))
    params["ad1"] = dense(keys[next(ki)], DHEAD, (HEADS, DHEAD))
    params["g1"] = jnp.ones((1, HIDDEN), jnp.float32)
    params["be1"] = jnp.zeros((1, HIDDEN), jnp.float32)

    # conv2 / conv3: hidden -> hidden
    for l in ("2", "3"):
        params["w" + l] = dense(keys[next(ki)], HIDDEN, (HIDDEN, HIDDEN))
        params["b" + l] = jnp.zeros((1, HIDDEN), jnp.float32)
        params["as" + l] = dense(keys[next(ki)], DHEAD, (HEADS, DHEAD))
        params["ad" + l] = dense(keys[next(ki)], DHEAD, (HEADS, DHEAD))
        params["g" + l] = jnp.ones((1, HIDDEN), jnp.float32)
        params["be" + l] = jnp.zeros((1, HIDDEN), jnp.float32)

    # final linear: hidden -> out
    params["wl"] = dense(keys[next(ki)], HIDDEN, (HIDDEN, OUT_CHANNELS))
    params["bl"] = jnp.zeros((1, OUT_CHANNELS), jnp.float32)
    return params


# --------------------------------- main --------------------------------------
if __name__ == "__main__":
    key = jax.random.PRNGKey(0)
    k_x, k_p = jax.random.split(key)

    # node features for node type 'base'
    x = jax.random.normal(k_x, (N_NODES, IN_CHANNELS), jnp.float32)

    # deterministic edge set: self-loops + forward ring + backward ring
    ids = jnp.arange(N_NODES, dtype=jnp.int32)
    src = jnp.concatenate([ids, ids, ids])
    dst = jnp.concatenate([ids, (ids + 1) % N_NODES, (ids - 1) % N_NODES])
    edge_index = jnp.stack([src, dst], axis=0)          # [2, 48]

    params = init_params(k_p)

    out = heterogat_forward(x, edge_index, params)
    out = jax.block_until_ready(out)

    assert out.shape == (N_NODES, OUT_CHANNELS)
    assert bool(jnp.all(jnp.isfinite(out)))
    assert bool(jnp.allclose(jnp.sum(out, axis=-1), 1.0, atol=1e-5))
    print("KERNEL_OK")
</pallas_src>

<mosaic_0001>
module attributes {stable_mosaic.version = 11 : i64} {
  func.func @heterogat_kernel(%arg0: memref<16x16xf32, #tpu.memory_space<vmem>>, %arg1: memref<16x128xf32, #tpu.memory_space<vmem>>, %arg2: memref<16x128xf32, #tpu.memory_space<vmem>>, %arg3: memref<16x128xf32, #tpu.memory_space<vmem>>, %arg4: memref<8x128xf32, #tpu.memory_space<vmem>>, %arg5: memref<128x8xf32, #tpu.memory_space<vmem>>, %arg6: memref<128x64xf32, #tpu.memory_space<vmem>>, %arg7: memref<16x64xf32, #tpu.memory_space<vmem>>, %arg8: memref<1x64xf32, #tpu.memory_space<vmem>>, %arg9: memref<64x128xf32, #tpu.memory_space<vmem>>, %arg10: memref<64x128xf32, #tpu.memory_space<vmem>>, %arg11: memref<1x64xf32, #tpu.memory_space<vmem>>, %arg12: memref<1x64xf32, #tpu.memory_space<vmem>>, %arg13: memref<64x64xf32, #tpu.memory_space<vmem>>, %arg14: memref<1x64xf32, #tpu.memory_space<vmem>>, %arg15: memref<64x128xf32, #tpu.memory_space<vmem>>, %arg16: memref<64x128xf32, #tpu.memory_space<vmem>>, %arg17: memref<1x64xf32, #tpu.memory_space<vmem>>, %arg18: memref<1x64xf32, #tpu.memory_space<vmem>>, %arg19: memref<64x64xf32, #tpu.memory_space<vmem>>, %arg20: memref<1x64xf32, #tpu.memory_space<vmem>>, %arg21: memref<64x128xf32, #tpu.memory_space<vmem>>, %arg22: memref<64x128xf32, #tpu.memory_space<vmem>>, %arg23: memref<1x64xf32, #tpu.memory_space<vmem>>, %arg24: memref<1x64xf32, #tpu.memory_space<vmem>>, %arg25: memref<64x3xf32, #tpu.memory_space<vmem>>, %arg26: memref<1x3xf32, #tpu.memory_space<vmem>>, %arg27: memref<16x3xf32, #tpu.memory_space<vmem>>) attributes {dimension_semantics = [], scalar_prefetch = 0 : i64, scratch_operands = 0 : i64, tpu.core_type = #tpu.core_type<tc>} {
    %c0 = arith.constant 0 : index
    %c0_0 = arith.constant 0 : index
    %0 = vector.load %arg0[%c0, %c0_0] : memref<16x16xf32, #tpu.memory_space<vmem>>, vector<16x16xf32>
    %c0_1 = arith.constant 0 : index
    %c0_2 = arith.constant 0 : index
    %1 = vector.load %arg1[%c0_1, %c0_2] : memref<16x128xf32, #tpu.memory_space<vmem>>, vector<16x128xf32>
    %c0_3 = arith.constant 0 : index
    %c0_4 = arith.constant 0 : index
    %2 = vector.load %arg2[%c0_3, %c0_4] : memref<16x128xf32, #tpu.memory_space<vmem>>, vector<16x128xf32>
    %c0_5 = arith.constant 0 : index
    %c0_6 = arith.constant 0 : index
    %3 = vector.load %arg3[%c0_5, %c0_6] : memref<16x128xf32, #tpu.memory_space<vmem>>, vector<16x128xf32>
    %c0_7 = arith.constant 0 : index
    %c0_8 = arith.constant 0 : index
    %4 = vector.load %arg4[%c0_7, %c0_8] : memref<8x128xf32, #tpu.memory_space<vmem>>, vector<8x128xf32>
    %c0_9 = arith.constant 0 : index
    %c0_10 = arith.constant 0 : index
    %5 = vector.load %arg5[%c0_9, %c0_10] : memref<128x8xf32, #tpu.memory_space<vmem>>, vector<128x8xf32>
    %c0_11 = arith.constant 0 : index
    %c0_12 = arith.constant 0 : index
    %6 = vector.load %arg6[%c0_11, %c0_12] : memref<128x64xf32, #tpu.memory_space<vmem>>, vector<128x64xf32>
    %c0_13 = arith.constant 0 : index
    %c0_14 = arith.constant 0 : index
    %7 = vector.load %arg7[%c0_13, %c0_14] : memref<16x64xf32, #tpu.memory_space<vmem>>, vector<16x64xf32>
    %cst = arith.constant dense<0.000000e+00> : vector<16x64xf32>
    %8 = tpu.matmul %0, %7, %cst {dimension_numbers = #tpu.dot_dimension_numbers<[1], [0], [0], [1], [0, 0, 1, 1], [], []>} : vector<16x16xf32>, vector<16x64xf32>, vector<16x64xf32> -> vector<16x64xf32>
    %c0_15 = arith.constant 0 : index
    %c0_16 = arith.constant 0 : index
    %9 = vector.load %arg8[%c0_15, %c0_16] : memref<1x64xf32, #tpu.memory_space<vmem>>, vector<1x64xf32>
    %10 = vector.broadcast %9 : vector<1x64xf32> to vector<16x64xf32>
    %11 = arith.addf %8, %10 : vector<16x64xf32>
    %c0_17 = arith.constant 0 : index
    %c0_18 = arith.constant 0 : index
    %12 = vector.load %arg9[%c0_17, %c0_18] : memref<64x128xf32, #tpu.memory_space<vmem>>, vector<64x128xf32>
    %cst_19 = arith.constant dense<0.000000e+00> : vector<16x128xf32>
    %13 = tpu.matmul %11, %12, %cst_19 {dimension_numbers = #tpu.dot_dimension_numbers<[1], [0], [0], [1], [0, 0, 1, 1], [], []>} : vector<16x64xf32>, vector<64x128xf32>, vector<16x128xf32> -> vector<16x128xf32>
    %14 = arith.mulf %13, %3 : vector<16x128xf32>
    %cst_20 = arith.constant dense<0.000000e+00> : vector<128xf32>
    %15 = vector.multi_reduction <add>, %14, %cst_20 [0] : vector<16x128xf32> to vector<128xf32>
    %16 = vector.shape_cast %15 : vector<128xf32> to vector<1x128xf32>
    %c0_21 = arith.constant 0 : index
    %c0_22 = arith.constant 0 : index
    %17 = vector.load %arg10[%c0_21, %c0_22] : memref<64x128xf32, #tpu.memory_space<vmem>>, vector<64x128xf32>
    %cst_23 = arith.constant dense<0.000000e+00> : vector<16x128xf32>
    %18 = tpu.matmul %11, %17, %cst_23 {dimension_numbers = #tpu.dot_dimension_numbers<[1], [0], [0], [1], [0, 0, 1, 1], [], []>} : vector<16x64xf32>, vector<64x128xf32>, vector<16x128xf32> -> vector<16x128xf32>
    %19 = vector.broadcast %16 : vector<1x128xf32> to vector<16x128xf32>
    %20 = arith.addf %18, %19 : vector<16x128xf32>
    %cst_24 = arith.constant 2.000000e-01 : f32
    %21 = vector.broadcast %cst_24 : f32 to vector<16x128xf32>
    %22 = arith.mulf %21, %20 : vector<16x128xf32>
    %23 = arith.maximumf %20, %22 : vector<16x128xf32>
    %24 = arith.addf %23, %1 : vector<16x128xf32>
    %cst_25 = arith.constant dense<0xFF800000> : vector<16xf32>
    %25 = vector.multi_reduction <maximumf>, %24, %cst_25 [1] : vector<16x128xf32> to vector<16xf32>
    %26 = vector.shape_cast %25 : vector<16xf32> to vector<16x1xf32>
    %27 = vector.broadcast %26 : vector<16x1xf32> to vector<16x128xf32>
    %28 = arith.subf %24, %27 : vector<16x128xf32>
    %29 = math.exp %28 : vector<16x128xf32>
    %30 = arith.mulf %29, %2 : vector<16x128xf32>
    %cst_26 = arith.constant dense<0.000000e+00> : vector<16x8xf32>
    %31 = tpu.matmul %30, %5, %cst_26 {dimension_numbers = #tpu.dot_dimension_numbers<[1], [0], [0], [1], [0, 0, 1, 1], [], []>} : vector<16x128xf32>, vector<128x8xf32>, vector<16x8xf32> -> vector<16x8xf32>
    %cst_27 = arith.constant 0.000000e+00 : f32
    %32 = vector.broadcast %cst_27 : f32 to vector<16x8xf32>
    %33 = arith.cmpf ogt, %31, %32 : vector<16x8xf32>
    %cst_28 = arith.constant 1.000000e+00 : f32
    %34 = vector.broadcast %cst_28 : f32 to vector<16x8xf32>
    %35 = arith.select %33, %31, %34 : vector<16x8xi1>, vector<16x8xf32>
    %36 = tpu.reciprocal %35 {approx = true} : vector<16x8xf32> -> vector<16x8xf32>
    %cst_29 = arith.constant dense<0.000000e+00> : vector<16x128xf32>
    %37 = tpu.matmul %36, %4, %cst_29 {dimension_numbers = #tpu.dot_dimension_numbers<[1], [0], [0], [1], [0, 0, 1, 1], [], []>} : vector<16x8xf32>, vector<8x128xf32>, vector<16x128xf32> -> vector<16x128xf32>
    %38 = arith.mulf %30, %37 : vector<16x128xf32>
    %39 = tpu.concatenate %11, %11, %11, %11, %11, %11, %11, %11 in 0 : vector<16x64xf32>, vector<16x64xf32>, vector<16x64xf32>, vector<16x64xf32>, vector<16x64xf32>, vector<16x64xf32>, vector<16x64xf32>, vector<16x64xf32> -> vector<128x64xf32>
    %40 = arith.mulf %39, %6 : vector<128x64xf32>
    %cst_30 = arith.constant dense<0.000000e+00> : vector<16x64xf32>
    %41 = tpu.matmul %38, %40, %cst_30 {dimension_numbers = #tpu.dot_dimension_numbers<[1], [0], [0], [1], [0, 0, 1, 1], [], []>} : vector<16x128xf32>, vector<128x64xf32>, vector<16x64xf32> -> vector<16x64xf32>
    %cst_31 = arith.constant 0.000000e+00 : f32
    %42 = vector.broadcast %cst_31 : f32 to vector<16x64xf32>
    %43 = arith.maximumf %41, %42 : vector<16x64xf32>
    %cst_32 = arith.constant dense<0.000000e+00> : vector<16xf32>
    %44 = vector.multi_reduction <add>, %43, %cst_32 [1] : vector<16x64xf32> to vector<16xf32>
    %45 = vector.shape_cast %44 : vector<16xf32> to vector<16x1xf32>
    %cst_33 = arith.constant 6.400000e+01 : f32
    %46 = vector.broadcast %cst_33 : f32 to vector<16x1xf32>
    %47 = arith.divf %45, %46 : vector<16x1xf32>
    %48 = vector.broadcast %47 : vector<16x1xf32> to vector<16x64xf32>
    %49 = arith.subf %43, %48 : vector<16x64xf32>
    %50 = arith.mulf %49, %49 : vector<16x64xf32>
    %cst_34 = arith.constant dense<0.000000e+00> : vector<16xf32>
    %51 = vector.multi_reduction <add>, %50, %cst_34 [1] : vector<16x64xf32> to vector<16xf32>
    %52 = vector.shape_cast %51 : vector<16xf32> to vector<16x1xf32>
    %cst_35 = arith.constant 6.400000e+01 : f32
    %53 = vector.broadcast %cst_35 : f32 to vector<16x1xf32>
    %54 = arith.divf %52, %53 : vector<16x1xf32>
    %55 = vector.broadcast %47 : vector<16x1xf32> to vector<16x64xf32>
    %56 = arith.subf %43, %55 : vector<16x64xf32>
    %cst_36 = arith.constant 9.99999974E-6 : f32
    %57 = vector.broadcast %cst_36 : f32 to vector<16x1xf32>
    %58 = arith.addf %54, %57 : vector<16x1xf32>
    %59 = math.rsqrt %58 : vector<16x1xf32>
    %60 = vector.broadcast %59 : vector<16x1xf32> to vector<16x64xf32>
    %61 = arith.mulf %56, %60 : vector<16x64xf32>
    %c0_37 = arith.constant 0 : index
    %c0_38 = arith.constant 0 : index
    %62 = vector.load %arg11[%c0_37, %c0_38] : memref<1x64xf32, #tpu.memory_space<vmem>>, vector<1x64xf32>
    %63 = vector.broadcast %62 : vector<1x64xf32> to vector<16x64xf32>
    %64 = arith.mulf %61, %63 : vector<16x64xf32>
    %c0_39 = arith.constant 0 : index
    %c0_40 = arith.constant 0 : index
    %65 = vector.load %arg12[%c0_39, %c0_40] : memref<1x64xf32, #tpu.memory_space<vmem>>, vector<1x64xf32>
    %66 = vector.broadcast %65 : vector<1x64xf32> to vector<16x64xf32>
    %67 = arith.addf %64, %66 : vector<16x64xf32>
    %c0_41 = arith.constant 0 : index
    %c0_42 = arith.constant 0 : index
    %68 = vector.load %arg13[%c0_41, %c0_42] : memref<64x64xf32, #tpu.memory_space<vmem>>, vector<64x64xf32>
    %cst_43 = arith.constant dense<0.000000e+00> : vector<16x64xf32>
    %69 = tpu.matmul %67, %68, %cst_43 {dimension_numbers = #tpu.dot_dimension_numbers<[1], [0], [0], [1], [0, 0, 1, 1], [], []>} : vector<16x64xf32>, vector<64x64xf32>, vector<16x64xf32> -> vector<16x64xf32>
    %c0_44 = arith.constant 0 : index
    %c0_45 = arith.constant 0 : index
    %70 = vector.load %arg14[%c0_44, %c0_45] : memref<1x64xf32, #tpu.memory_space<vmem>>, vector<1x64xf32>
    %71 = vector.broadcast %70 : vector<1x64xf32> to vector<16x64xf32>
    %72 = arith.addf %69, %71 : vector<16x64xf32>
    %c0_46 = arith.constant 0 : index
    %c0_47 = arith.constant 0 : index
    %73 = vector.load %arg15[%c0_46, %c0_47] : memref<64x128xf32, #tpu.memory_space<vmem>>, vector<64x128xf32>
    %cst_48 = arith.constant dense<0.000000e+00> : vector<16x128xf32>
    %74 = tpu.matmul %72, %73, %cst_48 {dimension_numbers = #tpu.dot_dimension_numbers<[1], [0], [0], [1], [0, 0, 1, 1], [], []>} : vector<16x64xf32>, vector<64x128xf32>, vector<16x128xf32> -> vector<16x128xf32>
    %75 = arith.mulf %74, %3 : vector<16x128xf32>
    %cst_49 = arith.constant dense<0.000000e+00> : vector<128xf32>
    %76 = vector.multi_reduction <add>, %75, %cst_49 [0] : vector<16x128xf32> to vector<128xf32>
    %77 = vector.shape_cast %76 : vector<128xf32> to vector<1x128xf32>
    %c0_50 = arith.constant 0 : index
    %c0_51 = arith.constant 0 : index
    %78 = vector.load %arg16[%c0_50, %c0_51] : memref<64x128xf32, #tpu.memory_space<vmem>>, vector<64x128xf32>
    %cst_52 = arith.constant dense<0.000000e+00> : vector<16x128xf32>
    %79 = tpu.matmul %72, %78, %cst_52 {dimension_numbers = #tpu.dot_dimension_numbers<[1], [0], [0], [1], [0, 0, 1, 1], [], []>} : vector<16x64xf32>, vector<64x128xf32>, vector<16x128xf32> -> vector<16x128xf32>
    %80 = vector.broadcast %77 : vector<1x128xf32> to vector<16x128xf32>
    %81 = arith.addf %79, %80 : vector<16x128xf32>
    %cst_53 = arith.constant 2.000000e-01 : f32
    %82 = vector.broadcast %cst_53 : f32 to vector<16x128xf32>
    %83 = arith.mulf %82, %81 : vector<16x128xf32>
    %84 = arith.maximumf %81, %83 : vector<16x128xf32>
    %85 = arith.addf %84, %1 : vector<16x128xf32>
    %cst_54 = arith.constant dense<0xFF800000> : vector<16xf32>
    %86 = vector.multi_reduction <maximumf>, %85, %cst_54 [1] : vector<16x128xf32> to vector<16xf32>
    %87 = vector.shape_cast %86 : vector<16xf32> to vector<16x1xf32>
    %88 = vector.broadcast %87 : vector<16x1xf32> to vector<16x128xf32>
    %89 = arith.subf %85, %88 : vector<16x128xf32>
    %90 = math.exp %89 : vector<16x128xf32>
    %91 = arith.mulf %90, %2 : vector<16x128xf32>
    %cst_55 = arith.constant dense<0.000000e+00> : vector<16x8xf32>
    %92 = tpu.matmul %91, %5, %cst_55 {dimension_numbers = #tpu.dot_dimension_numbers<[1], [0], [0], [1], [0, 0, 1, 1], [], []>} : vector<16x128xf32>, vector<128x8xf32>, vector<16x8xf32> -> vector<16x8xf32>
    %cst_56 = arith.constant 0.000000e+00 : f32
    %93 = vector.broadcast %cst_56 : f32 to vector<16x8xf32>
    %94 = arith.cmpf ogt, %92, %93 : vector<16x8xf32>
    %cst_57 = arith.constant 1.000000e+00 : f32
    %95 = vector.broadcast %cst_57 : f32 to vector<16x8xf32>
    %96 = arith.select %94, %92, %95 : vector<16x8xi1>, vector<16x8xf32>
    %97 = tpu.reciprocal %96 {approx = true} : vector<16x8xf32> -> vector<16x8xf32>
    %cst_58 = arith.constant dense<0.000000e+00> : vector<16x128xf32>
    %98 = tpu.matmul %97, %4, %cst_58 {dimension_numbers = #tpu.dot_dimension_numbers<[1], [0], [0], [1], [0, 0, 1, 1], [], []>} : vector<16x8xf32>, vector<8x128xf32>, vector<16x128xf32> -> vector<16x128xf32>
    %99 = arith.mulf %91, %98 : vector<16x128xf32>
    %100 = tpu.concatenate %72, %72, %72, %72, %72, %72, %72, %72 in 0 : vector<16x64xf32>, vector<16x64xf32>, vector<16x64xf32>, vector<16x64xf32>, vector<16x64xf32>, vector<16x64xf32>, vector<16x64xf32>, vector<16x64xf32> -> vector<128x64xf32>
    %101 = arith.mulf %100, %6 : vector<128x64xf32>
    %cst_59 = arith.constant dense<0.000000e+00> : vector<16x64xf32>
    %102 = tpu.matmul %99, %101, %cst_59 {dimension_numbers = #tpu.dot_dimension_numbers<[1], [0], [0], [1], [0, 0, 1, 1], [], []>} : vector<16x128xf32>, vector<128x64xf32>, vector<16x64xf32> -> vector<16x64xf32>
    %cst_60 = arith.constant 0.000000e+00 : f32
    %103 = vector.broadcast %cst_60 : f32 to vector<16x64xf32>
    %104 = arith.maximumf %102, %103 : vector<16x64xf32>
    %cst_61 = arith.constant dense<0.000000e+00> : vector<16xf32>
    %105 = vector.multi_reduction <add>, %104, %cst_61 [1] : vector<16x64xf32> to vector<16xf32>
    %106 = vector.shape_cast %105 : vector<16xf32> to vector<16x1xf32>
    %cst_62 = arith.constant 6.400000e+01 : f32
    %107 = vector.broadcast %cst_62 : f32 to vector<16x1xf32>
    %108 = arith.divf %106, %107 : vector<16x1xf32>
    %109 = vector.broadcast %108 : vector<16x1xf32> to vector<16x64xf32>
    %110 = arith.subf %104, %109 : vector<16x64xf32>
    %111 = arith.mulf %110, %110 : vector<16x64xf32>
    %cst_63 = arith.constant dense<0.000000e+00> : vector<16xf32>
    %112 = vector.multi_reduction <add>, %111, %cst_63 [1] : vector<16x64xf32> to vector<16xf32>
    %113 = vector.shape_cast %112 : vector<16xf32> to vector<16x1xf32>
    %cst_64 = arith.constant 6.400000e+01 : f32
    %114 = vector.broadcast %cst_64 : f32 to vector<16x1xf32>
    %115 = arith.divf %113, %114 : vector<16x1xf32>
    %116 = vector.broadcast %108 : vector<16x1xf32> to vector<16x64xf32>
    %117 = arith.subf %104, %116 : vector<16x64xf32>
    %cst_65 = arith.constant 9.99999974E-6 : f32
    %118 = vector.broadcast %cst_65 : f32 to vector<16x1xf32>
    %119 = arith.addf %115, %118 : vector<16x1xf32>
    %120 = math.rsqrt %119 : vector<16x1xf32>
    %121 = vector.broadcast %120 : vector<16x1xf32> to vector<16x64xf32>
    %122 = arith.mulf %117, %121 : vector<16x64xf32>
    %c0_66 = arith.constant 0 : index
    %c0_67 = arith.constant 0 : index
    %123 = vector.load %arg17[%c0_66, %c0_67] : memref<1x64xf32, #tpu.memory_space<vmem>>, vector<1x64xf32>
    %124 = vector.broadcast %123 : vector<1x64xf32> to vector<16x64xf32>
    %125 = arith.mulf %122, %124 : vector<16x64xf32>
    %c0_68 = arith.constant 0 : index
    %c0_69 = arith.constant 0 : index
    %126 = vector.load %arg18[%c0_68, %c0_69] : memref<1x64xf32, #tpu.memory_space<vmem>>, vector<1x64xf32>
    %127 = vector.broadcast %126 : vector<1x64xf32> to vector<16x64xf32>
    %128 = arith.addf %125, %127 : vector<16x64xf32>
    %c0_70 = arith.constant 0 : index
    %c0_71 = arith.constant 0 : index
    %129 = vector.load %arg19[%c0_70, %c0_71] : memref<64x64xf32, #tpu.memory_space<vmem>>, vector<64x64xf32>
    %cst_72 = arith.constant dense<0.000000e+00> : vector<16x64xf32>
    %130 = tpu.matmul %128, %129, %cst_72 {dimension_numbers = #tpu.dot_dimension_numbers<[1], [0], [0], [1], [0, 0, 1, 1], [], []>} : vector<16x64xf32>, vector<64x64xf32>, vector<16x64xf32> -> vector<16x64xf32>
    %c0_73 = arith.constant 0 : index
    %c0_74 = arith.constant 0 : index
    %131 = vector.load %arg20[%c0_73, %c0_74] : memref<1x64xf32, #tpu.memory_space<vmem>>, vector<1x64xf32>
    %132 = vector.broadcast %131 : vector<1x64xf32> to vector<16x64xf32>
    %133 = arith.addf %130, %132 : vector<16x64xf32>
    %c0_75 = arith.constant 0 : index
    %c0_76 = arith.constant 0 : index
    %134 = vector.load %arg21[%c0_75, %c0_76] : memref<64x128xf32, #tpu.memory_space<vmem>>, vector<64x128xf32>
    %cst_77 = arith.constant dense<0.000000e+00> : vector<16x128xf32>
    %135 = tpu.matmul %133, %134, %cst_77 {dimension_numbers = #tpu.dot_dimension_numbers<[1], [0], [0], [1], [0, 0, 1, 1], [], []>} : vector<16x64xf32>, vector<64x128xf32>, vector<16x128xf32> -> vector<16x128xf32>
    %136 = arith.mulf %135, %3 : vector<16x128xf32>
    %cst_78 = arith.constant dense<0.000000e+00> : vector<128xf32>
    %137 = vector.multi_reduction <add>, %136, %cst_78 [0] : vector<16x128xf32> to vector<128xf32>
    %138 = vector.shape_cast %137 : vector<128xf32> to vector<1x128xf32>
    %c0_79 = arith.constant 0 : index
    %c0_80 = arith.constant 0 : index
    %139 = vector.load %arg22[%c0_79, %c0_80] : memref<64x128xf32, #tpu.memory_space<vmem>>, vector<64x128xf32>
    %cst_81 = arith.constant dense<0.000000e+00> : vector<16x128xf32>
    %140 = tpu.matmul %133, %139, %cst_81 {dimension_numbers = #tpu.dot_dimension_numbers<[1], [0], [0], [1], [0, 0, 1, 1], [], []>} : vector<16x64xf32>, vector<64x128xf32>, vector<16x128xf32> -> vector<16x128xf32>
    %141 = vector.broadcast %138 : vector<1x128xf32> to vector<16x128xf32>
    %142 = arith.addf %140, %141 : vector<16x128xf32>
    %cst_82 = arith.constant 2.000000e-01 : f32
    %143 = vector.broadcast %cst_82 : f32 to vector<16x128xf32>
    %144 = arith.mulf %143, %142 : vector<16x128xf32>
    %145 = arith.maximumf %142, %144 : vector<16x128xf32>
    %146 = arith.addf %145, %1 : vector<16x128xf32>
    %cst_83 = arith.constant dense<0xFF800000> : vector<16xf32>
    %147 = vector.multi_reduction <maximumf>, %146, %cst_83 [1] : vector<16x128xf32> to vector<16xf32>
    %148 = vector.shape_cast %147 : vector<16xf32> to vector<16x1xf32>
    %149 = vector.broadcast %148 : vector<16x1xf32> to vector<16x128xf32>
    %150 = arith.subf %146, %149 : vector<16x128xf32>
    %151 = math.exp %150 : vector<16x128xf32>
    %152 = arith.mulf %151, %2 : vector<16x128xf32>
    %cst_84 = arith.constant dense<0.000000e+00> : vector<16x8xf32>
    %153 = tpu.matmul %152, %5, %cst_84 {dimension_numbers = #tpu.dot_dimension_numbers<[1], [0], [0], [1], [0, 0, 1, 1], [], []>} : vector<16x128xf32>, vector<128x8xf32>, vector<16x8xf32> -> vector<16x8xf32>
    %cst_85 = arith.constant 0.000000e+00 : f32
    %154 = vector.broadcast %cst_85 : f32 to vector<16x8xf32>
    %155 = arith.cmpf ogt, %153, %154 : vector<16x8xf32>
    %cst_86 = arith.constant 1.000000e+00 : f32
    %156 = vector.broadcast %cst_86 : f32 to vector<16x8xf32>
    %157 = arith.select %155, %153, %156 : vector<16x8xi1>, vector<16x8xf32>
    %158 = tpu.reciprocal %157 {approx = true} : vector<16x8xf32> -> vector<16x8xf32>
    %cst_87 = arith.constant dense<0.000000e+00> : vector<16x128xf32>
    %159 = tpu.matmul %158, %4, %cst_87 {dimension_numbers = #tpu.dot_dimension_numbers<[1], [0], [0], [1], [0, 0, 1, 1], [], []>} : vector<16x8xf32>, vector<8x128xf32>, vector<16x128xf32> -> vector<16x128xf32>
    %160 = arith.mulf %152, %159 : vector<16x128xf32>
    %161 = tpu.concatenate %133, %133, %133, %133, %133, %133, %133, %133 in 0 : vector<16x64xf32>, vector<16x64xf32>, vector<16x64xf32>, vector<16x64xf32>, vector<16x64xf32>, vector<16x64xf32>, vector<16x64xf32>, vector<16x64xf32> -> vector<128x64xf32>
    %162 = arith.mulf %161, %6 : vector<128x64xf32>
    %cst_88 = arith.constant dense<0.000000e+00> : vector<16x64xf32>
    %163 = tpu.matmul %160, %162, %cst_88 {dimension_numbers = #tpu.dot_dimension_numbers<[1], [0], [0], [1], [0, 0, 1, 1], [], []>} : vector<16x128xf32>, vector<128x64xf32>, vector<16x64xf32> -> vector<16x64xf32>
    %cst_89 = arith.constant 0.000000e+00 : f32
    %164 = vector.broadcast %cst_89 : f32 to vector<16x64xf32>
    %165 = arith.maximumf %163, %164 : vector<16x64xf32>
    %cst_90 = arith.constant dense<0.000000e+00> : vector<16xf32>
    %166 = vector.multi_reduction <add>, %165, %cst_90 [1] : vector<16x64xf32> to vector<16xf32>
    %167 = vector.shape_cast %166 : vector<16xf32> to vector<16x1xf32>
    %cst_91 = arith.constant 6.400000e+01 : f32
    %168 = vector.broadcast %cst_91 : f32 to vector<16x1xf32>
    %169 = arith.divf %167, %168 : vector<16x1xf32>
    %170 = vector.broadcast %169 : vector<16x1xf32> to vector<16x64xf32>
    %171 = arith.subf %165, %170 : vector<16x64xf32>
    %172 = arith.mulf %171, %171 : vector<16x64xf32>
    %cst_92 = arith.constant dense<0.000000e+00> : vector<16xf32>
    %173 = vector.multi_reduction <add>, %172, %cst_92 [1] : vector<16x64xf32> to vector<16xf32>
    %174 = vector.shape_cast %173 : vector<16xf32> to vector<16x1xf32>
    %cst_93 = arith.constant 6.400000e+01 : f32
    %175 = vector.broadcast %cst_93 : f32 to vector<16x1xf32>
    %176 = arith.divf %174, %175 : vector<16x1xf32>
    %177 = vector.broadcast %169 : vector<16x1xf32> to vector<16x64xf32>
    %178 = arith.subf %165, %177 : vector<16x64xf32>
    %cst_94 = arith.constant 9.99999974E-6 : f32
    %179 = vector.broadcast %cst_94 : f32 to vector<16x1xf32>
    %180 = arith.addf %176, %179 : vector<16x1xf32>
    %181 = math.rsqrt %180 : vector<16x1xf32>
    %182 = vector.broadcast %181 : vector<16x1xf32> to vector<16x64xf32>
    %183 = arith.mulf %178, %182 : vector<16x64xf32>
    %c0_95 = arith.constant 0 : index
    %c0_96 = arith.constant 0 : index
    %184 = vector.load %arg23[%c0_95, %c0_96] : memref<1x64xf32, #tpu.memory_space<vmem>>, vector<1x64xf32>
    %185 = vector.broadcast %184 : vector<1x64xf32> to vector<16x64xf32>
    %186 = arith.mulf %183, %185 : vector<16x64xf32>
    %c0_97 = arith.constant 0 : index
    %c0_98 = arith.constant 0 : index
    %187 = vector.load %arg24[%c0_97, %c0_98] : memref<1x64xf32, #tpu.memory_space<vmem>>, vector<1x64xf32>
    %188 = vector.broadcast %187 : vector<1x64xf32> to vector<16x64xf32>
    %189 = arith.addf %186, %188 : vector<16x64xf32>
    %c0_99 = arith.constant 0 : index
    %c0_100 = arith.constant 0 : index
    %190 = vector.load %arg25[%c0_99, %c0_100] : memref<64x3xf32, #tpu.memory_space<vmem>>, vector<64x3xf32>
    %cst_101 = arith.constant dense<0.000000e+00> : vector<16x3xf32>
    %191 = tpu.matmul %189, %190, %cst_101 {dimension_numbers = #tpu.dot_dimension_numbers<[1], [0], [0], [1], [0, 0, 1, 1], [], []>} : vector<16x64xf32>, vector<64x3xf32>, vector<16x3xf32> -> vector<16x3xf32>
    %c0_102 = arith.constant 0 : index
    %c0_103 = arith.constant 0 : index
    %192 = vector.load %arg26[%c0_102, %c0_103] : memref<1x3xf32, #tpu.memory_space<vmem>>, vector<1x3xf32>
    %193 = vector.broadcast %192 : vector<1x3xf32> to vector<16x3xf32>
    %194 = arith.addf %191, %193 : vector<16x3xf32>
    %cst_104 = arith.constant dense<0xFF800000> : vector<16xf32>
    %195 = vector.multi_reduction <maximumf>, %194, %cst_104 [1] : vector<16x3xf32> to vector<16xf32>
    %196 = vector.shape_cast %195 : vector<16xf32> to vector<16x1xf32>
    %197 = vector.broadcast %196 : vector<16x1xf32> to vector<16x3xf32>
    %198 = arith.subf %194, %197 : vector<16x3xf32>
    %199 = math.exp %198 : vector<16x3xf32>
    %cst_105 = arith.constant dense<0.000000e+00> : vector<16xf32>
    %200 = vector.multi_reduction <add>, %199, %cst_105 [1] : vector<16x3xf32> to vector<16xf32>
    %201 = vector.shape_cast %200 : vector<16xf32> to vector<16x1xf32>
    %202 = vector.broadcast %201 : vector<16x1xf32> to vector<16x3xf32>
    %203 = arith.divf %199, %202 : vector<16x3xf32>
    %c0_106 = arith.constant 0 : index
    %c0_107 = arith.constant 0 : index
    %204 = vector.load %arg27[%c0_106, %c0_107] : memref<16x3xf32, #tpu.memory_space<vmem>>, vector<16x3xf32>
    tpu.vector_store %arg27[%c0_106, %c0_107], %203 {strides = array<i32>} : memref<16x3xf32, #tpu.memory_space<vmem>>, vector<16x3xf32>,
    return
  }
}

</mosaic_0001>

<bundles_post_ra>
// kernel: tile.19
= control target key start
LH: loop header
LB: loop body
LE: loop exit
PB: predicated region body
PF: predicated region fallthrough
CT: control target
= control target key end

     0   :  { %vm4_vm0 = vcmask 1047556   ;;  %s209_s14 = smov 96   ;;  %s210_s15 = smov 112   ;;  %vm6_vm1 = vcmask 130048   ;;  %vm25_vm2 = vcmask 1048448   ;;  %vm46_vm3 = vcmask 917248   ;;  %s386_s0 = inlined_call_operand.vmem [shape: f32[16,8,16], index: 0, kind: input, shape index: {}]   ;;  %s387_s1 = inlined_call_operand.vmem [shape: f32[16,128], index: 1, kind: output, shape index: {}]  }
   0x1   :  { %v172_v0 = vld [vmem:[%s386_s0 + $0x6] ss:$8 sm:$0xf]   ;;  %v167_v3 = vld [vmem:[%s386_s0 + $0x7] ss:$8 sm:$0xf]  }
   0x2   :  { %v173_v1 = vld [vmem:[%s386_s0 + $0x6] ss:$8 sm:$0xf0]   ;;  %v168_v4 = vld [vmem:[%s386_s0 + $0x7] ss:$8 sm:$0xf0]  }
   0x3   :  { %v43_v2 = vsel %vm4_vm0, %v173_v1, %v172_v0  ;;  %v22_v5 = vsel %vm4_vm0, %v168_v4, %v167_v3  ;;  %v174_v6 = vld [vmem:[%s386_s0 + $0x46] ss:$8 sm:$0xf]   ;;  %v169_v8 = vld [vmem:[%s386_s0 + $0x47] ss:$8 sm:$0xf]  }
   0x4   :  { %44 = vrot.lane.b32.xlu1 %v43_v2, %s209_s14  ;;  %23 = vrot.lane.b32.xlu0 %v22_v5, %s210_s15  ;;  %v175_v7 = vld [vmem:[%s386_s0 + $0x46] ss:$8 sm:$0xf0]   ;;  %v170_v9 = vld [vmem:[%s386_s0 + $0x47] ss:$8 sm:$0xf0]  }
   0x5   :  { %v53_v10 = vsel %vm4_vm0, %v175_v7, %v174_v6  ;;  %v32_v11 = vsel %vm4_vm0, %v170_v9, %v169_v8  ;;  %v177_v12 = vld [vmem:[%s386_s0 + $0x5] ss:$8 sm:$0xf]   ;;  %v184_v15 = vld [vmem:[%s386_s0 + $0x44] ss:$8 sm:$0xf]  }
   0x6   :  { %v178_v13 = vld [vmem:[%s386_s0 + $0x5] ss:$8 sm:$0xf0]   ;;  %v185_v16 = vld [vmem:[%s386_s0 + $0x44] ss:$8 sm:$0xf0]  }
   0x7   :  { %v64_v14 = vsel %vm4_vm0, %v178_v13, %v177_v12  ;;  %s211_s3 = smov 80   ;;  %v182_v17 = vld [vmem:[%s386_s0 + $0x4] ss:$8 sm:$0xf]   ;;  %v95_v21 = vsel %vm4_vm0, %v185_v16, %v184_v15  ;;  %s212_s12 = smov 64   ;;  %vm67_vm4 = vcmask 786048  }
   0x8   :  { %65 = vrot.lane.b32.xlu2 %v64_v14, %s211_s3  ;;  %v183_v18 = vld [vmem:[%s386_s0 + $0x4] ss:$8 sm:$0xf0]   ;;  %v179_v19 = vld [vmem:[%s386_s0 + $0x45] ss:$8 sm:$0xf]  }
   0x9   :  { %v180_v20 = vld [vmem:[%s386_s0 + $0x45] ss:$8 sm:$0xf0]   ;;  %v85_v22 = vsel %vm4_vm0, %v183_v18, %v182_v17  ;;  %v192_v24 = vld [vmem:[%s386_s0 + $0x2] ss:$8 sm:$0xf]  }
   0xa   :  { %v74_v23 = vsel %vm4_vm0, %v180_v20, %v179_v19  ;;  %v193_v25 = vld [vmem:[%s386_s0 + $0x2] ss:$8 sm:$0xf0]   ;;  %v189_v26 = vld [vmem:[%s386_s0 + $0x43] ss:$8 sm:$0xf]  }
   0xb   :  { %v190_v27 = vld [vmem:[%s386_s0 + $0x43] ss:$8 sm:$0xf0]   ;;  %v127_v30 = vsel %vm4_vm0, %v193_v25, %v192_v24  ;;  %s213_s25 = smov 32   ;;  %s214_s26 = smov 48   ;;  %vm88_vm5 = vcmask 654848  }
   0xc   :  { %54 = vrot.lane.b32.xlu1 %v53_v10, %s209_s14  ;;  %33 = vrot.lane.b32.xlu0 %v32_v11, %s210_s15  ;;  %v187_v28 = vld [vmem:[%s386_s0 + $0x3] ss:$8 sm:$0xf]   ;;  %v116_v31 = vsel %vm4_vm0, %v190_v27, %v189_v26  ;;  %v199_v33 = vld [vmem:[%s386_s0 + $0x41] ss:$8 sm:$0xf]  }
   0xd   :  { %v188_v29 = vld [vmem:[%s386_s0 + $0x3] ss:$8 sm:$0xf0]   ;;  %v200_v34 = vld [vmem:[%s386_s0 + $0x41] ss:$8 sm:$0xf0]  }
   0xe   :  { %v106_v32 = vsel %vm4_vm0, %v188_v29, %v187_v28  ;;  %v197_v35 = vld [vmem:[%s386_s0 + $0x1] ss:$8 sm:$0xf]   ;;  %v194_v37 = vld [vmem:[%s386_s0 + $0x42] ss:$8 sm:$0xf]   ;;  %v158_v39 = vsel %vm4_vm0, %v200_v34, %v199_v33 }
   0xf   :  { %v198_v36 = vld [vmem:[%s386_s0 + $0x1] ss:$8 sm:$0xf0]   ;;  %v195_v38 = vld [vmem:[%s386_s0 + $0x42] ss:$8 sm:$0xf0]  }
  0x10   :  { %75 = vrot.lane.b32.xlu2 %v74_v23, %s211_s3  ;;  %v148_v40 = vsel %vm4_vm0, %v198_v36, %v197_v35  ;;  %v137_v41 = vsel %vm4_vm0, %v195_v38, %v194_v37  ;;  %s215_s10 = smov 16   ;;  %v2_v42 = vld [vmem:[%s386_s0] ss:$8 sm:$0xf]   ;;  %vm109_vm6 = vcmask 523648   ;;  %vm130_vm7 = vcmask 392448  }
  0x11   :  { %v3_v43 = vld [vmem:[%s386_s0] ss:$8 sm:$0xf0]   ;;  %vm151_vm8 = vcmask 261248  }
  0x12   :  { %v5_v44 = vsel %vm4_vm0, %v3_v43, %v2_v42  ;;  %v164_v45 = vld [vmem:[%s386_s0 + $0x40] ss:$8 sm:$0xf]  }
  0x13   :  { %7 = vst.msk [vmem:[%s387_s1] sm:$0xff] %vm6_vm1, %v5_v44   ;;  %v165_v46 = vld [vmem:[%s386_s0 + $0x40] ss:$8 sm:$0xf0]  }
  0x14   :  { %96 = vrot.lane.b32.xlu1 %v95_v21, %s212_s12  ;;  %86 = vrot.lane.b32.xlu0 %v85_v22, %s212_s12  ;;  %v13_v47 = vsel %vm4_vm0, %v165_v46, %v164_v45 }
  0x15   :  { %166 = vst.msk [vmem:[%s387_s1 + $0x8] sm:$0xff] %vm6_vm1, %v13_v47  }
  0x18   :  { %107 = vrot.lane.b32.xlu2 %v106_v32, %s214_s26 }
  0x1c   :  { %128 = vrot.lane.b32.xlu1 %v127_v30, %s213_s25  ;;  %117 = vrot.lane.b32.xlu0 %v116_v31, %s214_s26 }
  0x20   :  { %138 = vrot.lane.b32.xlu2 %v137_v41, %s213_s25 }
  0x24   :  { %159 = vrot.lane.b32.xlu1 %v158_v39, %s215_s10  ;;  %149 = vrot.lane.b32.xlu0 %v148_v40, %s215_s10 }
  0x62   :  { %v66_v48 = vpop.permute.xlu2 %65  }
  0x6a   :  { %v76_v49 = vpop.permute.xlu2 %75  }
  0x72   :  { %v108_v52 = vpop.permute.xlu2 %107  }
  0x76   :  { %v45_v50 = vpop.permute.xlu1 %44   ;;  %v24_v51 = vpop.permute.xlu0 %23  }
  0x77   :  { %26 = vst.msk [vmem:[%s387_s1] sm:$0xff] %vm25_vm2, %v24_v51  }
  0x78   :  { %47 = vst.msk [vmem:[%s387_s1] sm:$0xff] %vm46_vm3, %v45_v50  }
  0x79   :  { %68 = vst.msk [vmem:[%s387_s1] sm:$0xff] %vm67_vm4, %v66_v48  }
  0x7a   :  { %v139_v55 = vpop.permute.xlu2 %138  }
  0x7e   :  { %v55_v53 = vpop.permute.xlu1 %54   ;;  %v34_v54 = vpop.permute.xlu0 %33  }
  0x7f   :  { %171 = vst.msk [vmem:[%s387_s1 + $0x8] sm:$0xff] %vm25_vm2, %v34_v54  }
  0x80   :  { %176 = vst.msk [vmem:[%s387_s1 + $0x8] sm:$0xff] %vm46_vm3, %v55_v53  }
  0x81   :  { %181 = vst.msk [vmem:[%s387_s1 + $0x8] sm:$0xff] %vm67_vm4, %v76_v49  }
  0x86   :  { %v97_v56 = vpop.permute.xlu1 %96   ;;  %v87_v57 = vpop.permute.xlu0 %86  }
  0x87   :  { %186 = vst.msk [vmem:[%s387_s1 + $0x8] sm:$0xff] %vm88_vm5, %v97_v56  }
  0x88   :  { %89 = vst.msk [vmem:[%s387_s1] sm:$0xff] %vm88_vm5, %v87_v57  }
  0x89   :  { %110 = vst.msk [vmem:[%s387_s1] sm:$0xff] %vm109_vm6, %v108_v52  }
  0x8e   :  { %v129_v58 = vpop.permute.xlu1 %128   ;;  %v118_v59 = vpop.permute.xlu0 %117  }
  0x8f   :  { %131 = vst.msk [vmem:[%s387_s1] sm:$0xff] %vm130_vm7, %v129_v58  }
  0x90   :  { %191 = vst.msk [vmem:[%s387_s1 + $0x8] sm:$0xff] %vm109_vm6, %v118_v59  }
  0x91   :  { %196 = vst.msk [vmem:[%s387_s1 + $0x8] sm:$0xff] %vm130_vm7, %v139_v55  }
  0x96   :  { %v160_v60 = vpop.permute.xlu1 %159   ;;  %v150_v61 = vpop.permute.xlu0 %149  }
  0x97   :  { %201 = vst.msk [vmem:[%s387_s1 + $0x8] sm:$0xff] %vm151_vm8, %v160_v60  }
  0x98   :  { %152 = vst.msk [vmem:[%s387_s1] sm:$0xff] %vm151_vm8, %v150_v61  }

// kernel: heterogat_forward.1
= control target key start
LH: loop header
LB: loop body
LE: loop exit
PB: predicated region body
PF: predicated region fallthrough
CT: control target
= control target key end

     0   :  { %vm133_vm0 = vcmask 130048   ;;  %vm171_vm1 = vcmask 523264   ;;  %vm288_vm3 = vcmask 64512   ;;  %s2000_s7 = inlined_call_operand.vmem [shape: f32[16,64], index: 7, kind: input, shape index: {}]   ;;  %s2001_s0 = inlined_call_operand.vmem [shape: f32[16,16], index: 0, kind: input, shape index: {}]   ;;  %s2002_s9 = inlined_call_operand.vmem [shape: f32[64,128], index: 9, kind: input, shape index: {}]   ;;  %s2003_s10 = inlined_call_operand.vmem [shape: f32[64,128], index: 10, kind: input, shape index: {}]   ;;  %s2004_s8 = inlined_call_operand.vmem [shape: f32[1,64], index: 8, kind: input, shape index: {}]   ;;  %s2005_s4 = inlined_call_operand.vmem [shape: f32[8,128], index: 4, kind: input, shape index: {}]   ;;  %s2006_s6 = inlined_call_operand.vmem [shape: f32[128,64], index: 6, kind: input, shape index: {}]   ;;  %s2007_s3 = inlined_call_operand.vmem [shape: f32[16,128], index: 3, kind: input, shape index: {}]   ;;  %s2008_s5 = inlined_call_operand.vmem [shape: f32[128,8], index: 5, kind: input, shape index: {}]   ;;  %s2009_s1 = inlined_call_operand.vmem [shape: f32[16,128], index: 1, kind: input, shape index: {}]   ;;  %s2010_s2 = inlined_call_operand.vmem [shape: f32[16,128], index: 2, kind: input, shape index: {}]   ;;  %s2011_s11 = inlined_call_operand.vmem [shape: f32[1,64], index: 11, kind: input, shape index: {}]   ;;  %s2012_s12 = inlined_call_operand.vmem [shape: f32[1,64], index: 12, kind: input, shape index: {}]   ;;  %s2013_s14 = inlined_call_operand.vmem [shape: f32[1,64], index: 14, kind: input, shape index: {}]   ;;  %s2014_s13 = inlined_call_operand.vmem [shape: f32[64,64], index: 13, kind: input, shape index: {}]   ;;  %s2015_s15 = inlined_call_operand.vmem [shape: f32[64,128], index: 15, kind: input, shape index: {}]   ;;  %s2016_s16 = inlined_call_operand.vmem [shape: f32[64,128], index: 16, kind: input, shape index: {}]   ;;  %s2017_s17 = inlined_call_operand.vmem [shape: f32[1,64], index: 17, kind: input, shape index: {}]   ;;  %s2018_s18 = inlined_call_operand.vmem [shape: f32[1,64], index: 18, kind: input, shape index: {}]   ;;  %s2019_s20 = inlined_call_operand.vmem [shape: f32[1,64], index: 20, kind: input, shape index: {}]   ;;  %s2020_s19 = inlined_call_operand.vmem [shape: f32[64,64], index: 19, kind: input, shape index: {}]   ;;  %s2021_s21 = inlined_call_operand.vmem [shape: f32[64,128], index: 21, kind: input, shape index: {}]   ;;  %s2022_s22 = inlined_call_operand.vmem [shape: f32[64,128], index: 22, kind: input, shape index: {}]   ;;  %s2023_s23 = inlined_call_operand.vmem [shape: f32[1,64], index: 23, kind: input, shape index: {}]   ;;  %s2024_s24 = inlined_call_operand.vmem [shape: f32[1,64], index: 24, kind: input, shape index: {}]   ;;  %s2025_s26 = inlined_call_operand.vmem [shape: f32[1,3], index: 26, kind: input, shape index: {}]   ;;  %s2026_s25 = inlined_call_operand.vmem [shape: f32[64,3], index: 25, kind: input, shape index: {}]   ;;  %s2027_s27 = inlined_call_operand.vmem [shape: f32[16,3], index: 27, kind: output, shape index: {}]  }
   0x1   :  { %2038 = sst [smem:[#allocation2_spill]] %s2000_s7 }
   0x2   :  { %2039 = sst [smem:[#allocation3_spill]] %s2001_s0 }
   0x3   :  { %2040 = sst [smem:[#allocation4_spill]] %s2002_s9 }
   0x4   :  { %2041 = sst [smem:[#allocation5_spill]] %s2003_s10 }
   0x5   :  { %2042 = sst [smem:[#allocation6_spill]] %s2004_s8 }
   0x6   :  { %2043 = sst [smem:[#allocation7_spill]] %s2005_s4 }
   0x7   :  { %2044 = sst [smem:[#allocation8_spill]] %s2006_s6 }
   0x8   :  { %2045 = sst [smem:[#allocation9_spill]] %s2007_s3 }
   0x9   :  { %2046 = sst [smem:[#allocation10_spill]] %s2008_s5 }
   0xa   :  { %2047 = sst [smem:[#allocation11_spill]] %s2009_s1 }
   0xb   :  { %2048 = sst [smem:[#allocation12_spill]] %s2010_s2 }
   0xc   :  { %2049 = sst [smem:[#allocation13_spill]] %s2011_s11 }
   0xd   :  { %s2050_s9 = sld [smem:[#allocation2_spill]] }
   0xe   :  { %s2051_s0 = sld [smem:[#allocation3_spill]] }
   0xf   :  { %s2052_s6 = sld [smem:[#allocation5_spill]] }
  0x10   :  { %s2053_s3 = sld [smem:[#allocation4_spill]] }
  0x11   :  { %s2054_s28 = sld [smem:[#allocation7_spill]] }
  0x12   :  { %s2056_s7 = sld [smem:[#allocation8_spill]] }
  0x13   :  { %v128_v0 = vld [vmem:[%s2050_s9 + $0x8] sm:$0xff]  ;;  %v127_v1 = vld [vmem:[%s2050_s9] sm:$0xff]  ;;  %s2057_s1 = sld [smem:[#allocation9_spill]] }
  0x14   :  { %154 = vmatpush.msra.mxu0 %v128_v0  ;;  %v86_v2 = vld [vmem:[%s2051_s0] sm:$0xff]  ;;  %v87_v12 = vld [vmem:[%s2051_s0 + $0x8] sm:$0xff]  ;;  %s2055_s0 = sld [smem:[#allocation6_spill]] }
  0x15   :  { %v217_v3 = vld [vmem:[%s2052_s6 + $0x38] sm:$0xff]  ;;  %v216_v5 = vld [vmem:[%s2052_s6 + $0x30] sm:$0xff]  ;;  %v215_v6 = vld [vmem:[%s2052_s6 + $0x28] sm:$0xff]  ;;  %s2059_s30 = sld [smem:[#allocation11_spill]] }
  0x16   :  { %v170_v4 = vld [vmem:[%s2053_s3 + $0x38] sm:$0xff]  ;;  %226 = vmatpush.msra.mxu2 %v217_v3  ;;  %155 = vmatpush.msra.mxu0 %v127_v1  ;;  %v169_v7 = vld [vmem:[%s2053_s3 + $0x30] sm:$0xff]  ;;  %v214_v8 = vld [vmem:[%s2052_s6 + $0x20] sm:$0xff] }
  0x17   :  { %1106 = vmatmul.msk.f32.vlgmr.msra.gmra.mxu0 %vm133_vm0, %v86_v2  ;;  %v168_v9 = vld [vmem:[%s2053_s3 + $0x28] sm:$0xff]  ;;  %v213_v10 = vld [vmem:[%s2052_s6 + $0x18] sm:$0xff]  ;;  %v167_v11 = vld [vmem:[%s2053_s3 + $0x20] sm:$0xff] }
  0x18   :  { %227 = vmatpush.msra.mxu2 %v216_v5  ;;  %186 = vmatpush.msrb.mxu0 %v170_v4  ;;  %v212_v13 = vld [vmem:[%s2052_s6 + $0x10] sm:$0xff]  ;;  %v166_v14 = vld [vmem:[%s2053_s3 + $0x18] sm:$0xff]  ;;  %v164_v16 = vld [vmem:[%s2053_s3 + $0x8] sm:$0xff] }
  0x19   :  { %v165_v15 = vld [vmem:[%s2053_s3 + $0x10] sm:$0xff]  ;;  %v211_v17 = vld [vmem:[%s2052_s6 + $0x8] sm:$0xff]  ;;  %v163_v18 = vld [vmem:[%s2053_s3] sm:$0xff]  ;;  %s2060_s3 = sld [smem:[#allocation12_spill]] }
  0x1a   :  { %228 = vmatpush.msra.mxu2 %v215_v6  ;;  %187 = vmatpush.msrb.mxu0 %v169_v7  ;;  %v210_v19 = vld [vmem:[%s2052_s6] sm:$0xff]  ;;  %v1423_v25 = vld [vmem:[%s2056_s7 + $0x78] sm:$0xff]  ;;  %v1428_v27 = vld [vmem:[%s2056_s7 + $0x70] sm:$0xff]  ;;  %s2058_s6 = sld [smem:[#allocation10_spill]] }
  0x1b   :  { %v1412_v20 = vld [vmem:[%s2054_s28] sm:$0xff]  ;;  %v1436_v29 = vld [vmem:[%s2056_s7 + $0x68] sm:$0xff]  ;;  %v1448_v33 = vld [vmem:[%s2056_s7 + $0x58] sm:$0xff] }
  0x1c   :  { %229 = vmatpush.msra.mxu2 %v214_v8  ;;  %188 = vmatpush.msrb.mxu0 %v168_v9  ;;  %v1133_v21 = vld [vmem:[%s2055_s0] ss:$0 sm:$0xff]  ;;  %v1454_v35 = vld [vmem:[%s2056_s7 + $0x50] sm:$0xff]  ;;  %v1460_v37 = vld [vmem:[%s2056_s7 + $0x48] sm:$0xff] }
  0x1d   :  { %310 = vmatpush.msra.mxu1 %v1412_v20  ;;  %v1442_v31 = vld [vmem:[%s2056_s7 + $0x60] sm:$0xff]  ;;  %v1472_v41 = vld [vmem:[%s2056_s7 + $0x38] sm:$0xff]  ;;  %v1478_v43 = vld [vmem:[%s2056_s7 + $0x30] sm:$0xff] }
  0x1e   :  { %230 = vmatpush.msra.mxu2 %v213_v10  ;;  %189 = vmatpush.msrb.mxu0 %v167_v11  ;;  %v1466_v39 = vld [vmem:[%s2056_s7 + $0x40] sm:$0xff]  ;;  %v1484_v45 = vld [vmem:[%s2056_s7 + $0x28] sm:$0xff]  ;;  %v1496_v49 = vld [vmem:[%s2056_s7 + $0x18] sm:$0xff] }
  0x1f   :  { %1107 = vmatmul.msk.f32.gmra.mxu0 %vm133_vm0, %v87_v12  ;;  %v1490_v47 = vld [vmem:[%s2056_s7 + $0x20] sm:$0xff]  ;;  %v1502_v51 = vld [vmem:[%s2056_s7 + $0x10] sm:$0xff]  ;;  %v1508_v53 = vld [vmem:[%s2056_s7 + $0x8] sm:$0xff] }
  0x20   :  { %231 = vmatpush.msra.mxu2 %v212_v13  ;;  %190 = vmatpush.msrb.mxu0 %v166_v14  ;;  %v1514_v55 = vld [vmem:[%s2056_s7] sm:$0xff]  ;;  %v1526_v60 = vld [vmem:[%s2057_s1 + $0x8] sm:$0xff]  ;;  %v1533_v0 = vld [vmem:[%s2058_s6 + $0x78] sm:$0xff] }
  0x21   :  { %v1521_v59 = vld [vmem:[%s2057_s1] sm:$0xff]  ;;  %v1538_v1 = vld [vmem:[%s2058_s6 + $0x70] sm:$0xff]  ;;  %259 = vmatpush.msra.mxu3 %v1533_v0  ;;  %v1544_v3 = vld [vmem:[%s2058_s6 + $0x68] sm:$0xff] }
  0x22   :  { %191 = vmatpush.msrb.mxu0 %v165_v15  ;;  %232 = vmatpush.msra.mxu2 %v211_v17  ;;  %v1550_v5 = vld [vmem:[%s2058_s6 + $0x60] sm:$0xff]  ;;  %v1556_v7 = vld [vmem:[%s2058_s6 + $0x58] sm:$0xff]  ;;  %v1562_v10 = vld [vmem:[%s2058_s6 + $0x50] sm:$0xff] }
  0x23   :  { %260 = vmatpush.msra.mxu3 %v1538_v1  ;;  %v1568_v12 = vld [vmem:[%s2058_s6 + $0x48] sm:$0xff]  ;;  %v1574_v14 = vld [vmem:[%s2058_s6 + $0x40] sm:$0xff] }
  0x24   :  { %192 = vmatpush.msrb.mxu0 %v164_v16  ;;  %233 = vmatpush.msra.mxu2 %v210_v19  ;;  %v1580_v16 = vld [vmem:[%s2058_s6 + $0x38] sm:$0xff] }
  0x25   :  { %261 = vmatpush.msra.mxu3 %v1544_v3 }
  0x26   :  { %193 = vmatpush.msrb.mxu0 %v163_v18 }
  0x27   :  { %262 = vmatpush.msra.mxu3 %v1550_v5 }
  0x29   :  { %263 = vmatpush.msra.mxu3 %v1556_v7 }
  0x2b   :  { %264 = vmatpush.msra.mxu3 %v1562_v10 }
  0x2d   :  { %265 = vmatpush.msra.mxu3 %v1568_v12 }
  0x2f   :  { %266 = vmatpush.msra.mxu3 %v1574_v14 }
  0x31   :  { %267 = vmatpush.msra.mxu3 %v1580_v16 }
  0x94   :  { %v157_v22 = vpop.f32.mrf.mxu0 }
  0x95   :  { %v158_v23 = vadd.f32 %v1133_v21, %v157_v22  ;;  %v1587_v22 = vld [vmem:[%s2059_s30] sm:$0xff] }
  0x97   :  { %1108 = vmatmul.msk.f32.vlgmr.msrb.gmra.mxu0 %vm171_vm1, %v158_v23  ;;  %1110 = vmatmul.msk.f32.vlgmr.msra.gmra.mxu2 %vm171_vm1, %v158_v23  ;;  %v334_v30 = vmul.f32 %v158_v23, %v1428_v27  ;;  %v332_v34 = vmul.f32 %v158_v23, %v1442_v31  ;;  %v330_v38 = vmul.f32 %v158_v23, %v1454_v35 }
  0x98   :  { %v328_v42 = vmul.f32 %v158_v23, %v1466_v39  ;;  %v326_v46 = vmul.f32 %v158_v23, %v1478_v43  ;;  %v324_v50 = vmul.f32 %v158_v23, %v1490_v47  ;;  %v322_v54 = vmul.f32 %v158_v23, %v1502_v51 }
  0x99   :  { %v320_v57 = vmul.f32 %v158_v23, %v1514_v55 }
  0x9c   :  { %v160_v24 = vpop.f32.mrf.mxu0 }
  0x9d   :  { %v161_v26 = vadd.f32 %v1133_v21, %v160_v24 }
  0x9f   :  { %1109 = vmatmul.msk.f32.gmra.mxu0 %vm171_vm1, %v161_v26  ;;  %1111 = vmatmul.msk.f32.gmra.mxu2 %vm171_vm1, %v161_v26  ;;  %v335_v28 = vmul.f32 %v161_v26, %v1423_v25  ;;  %v333_v32 = vmul.f32 %v161_v26, %v1436_v29  ;;  %v331_v36 = vmul.f32 %v161_v26, %v1448_v33 }
  0xa0   :  { %v329_v40 = vmul.f32 %v161_v26, %v1460_v37  ;;  %v327_v44 = vmul.f32 %v161_v26, %v1472_v41  ;;  %v325_v48 = vmul.f32 %v161_v26, %v1484_v45  ;;  %v323_v52 = vmul.f32 %v161_v26, %v1496_v49 }
  0xa1   :  { %336 = vmatpush.msrb.mxu1 %v335_v28  ;;  %v321_v56 = vmul.f32 %v161_v26, %v1508_v53 }
  0xa3   :  { %337 = vmatpush.msrb.mxu1 %v334_v30  ;;  %v1593_v30 = vld [vmem:[%s2059_s30 + $0x8] sm:$0xff]  ;;  %s2061_s30 = sld [smem:[#allocation13_spill]] }
  0xa5   :  { %338 = vmatpush.msrb.mxu1 %v333_v32 }
  0xa7   :  { %339 = vmatpush.msrb.mxu1 %v332_v34  ;;  %v101_v34 = vld [vmem:[%s2058_s6 + $0x30] sm:$0xff] }
  0xa8   :  { %268 = vmatpush.msra.mxu3 %v101_v34 }
  0xa9   :  { %340 = vmatpush.msrb.mxu1 %v331_v36  ;;  %v100_v36 = vld [vmem:[%s2058_s6 + $0x28] sm:$0xff] }
  0xaa   :  { %269 = vmatpush.msra.mxu3 %v100_v36 }
  0xab   :  { %341 = vmatpush.msrb.mxu1 %v330_v38  ;;  %v99_v38 = vld [vmem:[%s2058_s6 + $0x20] sm:$0xff] }
  0xac   :  { %270 = vmatpush.msra.mxu3 %v99_v38 }
  0xad   :  { %342 = vmatpush.msrb.mxu1 %v329_v40  ;;  %v98_v40 = vld [vmem:[%s2058_s6 + $0x18] sm:$0xff] }
  0xae   :  { %271 = vmatpush.msra.mxu3 %v98_v40 }
  0xaf   :  { %343 = vmatpush.msrb.mxu1 %v328_v42  ;;  %v97_v42 = vld [vmem:[%s2058_s6 + $0x10] sm:$0xff] }
  0xb0   :  { %272 = vmatpush.msra.mxu3 %v97_v42 }
  0xb1   :  { %344 = vmatpush.msrb.mxu1 %v327_v44  ;;  %v96_v44 = vld [vmem:[%s2058_s6 + $0x8] sm:$0xff] }
  0xb2   :  { %273 = vmatpush.msra.mxu3 %v96_v44 }
  0xb3   :  { %345 = vmatpush.msrb.mxu1 %v326_v46  ;;  %v95_v46 = vld [vmem:[%s2058_s6] sm:$0xff] }
  0xb4   :  { %274 = vmatpush.msra.mxu3 %v95_v46 }
  0xb5   :  { %346 = vmatpush.msrb.mxu1 %v325_v48 }
  0xb6   :  { %560 = vmatpush.msrb.mxu3 %v1533_v0 }
  0xb7   :  { %347 = vmatpush.msrb.mxu1 %v324_v50 }
  0xb8   :  { %561 = vmatpush.msrb.mxu3 %v1538_v1 }
  0xb9   :  { %348 = vmatpush.msrb.mxu1 %v323_v52 }
  0xba   :  { %562 = vmatpush.msrb.mxu3 %v1544_v3 }
  0xbb   :  { %349 = vmatpush.msrb.mxu1 %v322_v54 }
  0xbc   :  { %563 = vmatpush.msrb.mxu3 %v1550_v5 }
  0xbd   :  { %350 = vmatpush.msrb.mxu1 %v321_v56 }
  0xbe   :  { %564 = vmatpush.msrb.mxu3 %v1556_v7 }
  0xbf   :  { %351 = vmatpush.msrb.mxu1 %v320_v57  ;;  %v1629_v57 = vld [vmem:[%s2060_s3] sm:$0xff] }
  0xc0   :  { %565 = vmatpush.msrb.mxu3 %v1562_v10 }
  0xc2   :  { %566 = vmatpush.msrb.mxu3 %v1568_v12 }
  0xc4   :  { %567 = vmatpush.msrb.mxu3 %v1574_v14 }
  0xc6   :  { %568 = vmatpush.msrb.mxu3 %v1580_v16 }
  0xc8   :  { %569 = vmatpush.msrb.mxu3 %v101_v34 }
  0xca   :  { %570 = vmatpush.msrb.mxu3 %v100_v36 }
  0xcc   :  { %571 = vmatpush.msrb.mxu3 %v99_v38 }
  0xce   :  { %572 = vmatpush.msrb.mxu3 %v98_v40 }
  0xd0   :  { %573 = vmatpush.msrb.mxu3 %v97_v42 }
  0xd2   :  { %574 = vmatpush.msrb.mxu3 %v96_v44 }
  0xd4   :  { %575 = vmatpush.msrb.mxu3 %v95_v46 }
 0x114   :  { %v195_v58 = vpop.f32.mrf.mxu0 }
 0x115   :  { %v201_v62 = vmul.f32 %v195_v58, %v1521_v59 }
 0x11a   :  { %v235_v8 = vpop.f32.mrf.mxu2 }
 0x11c   :  { %v198_v61 = vpop.f32.mrf.mxu0 }
 0x11d   :  { %v202_v63 = vmul.f32 %v198_v61, %v1526_v60 }
 0x11f   :  { %v203_v2 = vadd.f32 %v202_v63, %v201_v62  ;;  %v1636_v63 = vld [vmem:[%s2060_s3 + $0x8] sm:$0xff] }
 0x121   :  { %v204_v4 = vrot.slane %v203_v2, 4 }
 0x122   :  { %v238_v18 = vpop.f32.mrf.mxu2 }
 0x123   :  { %v205_v6 = vadd.f32 %v204_v4, %v203_v2 }
 0x125   :  { %v206_v9 = vrot.slane %v205_v6, 2 }
 0x127   :  { %v207_v11 = vadd.f32 %v206_v9, %v205_v6 }
 0x129   :  { %v208_v13 = vrot.slane %v207_v11, 1 }
 0x12b   :  { %v209_v15 = vadd.f32 %v208_v13, %v207_v11 }
 0x12d   :  { %v236_v17 = vadd.f32 %v235_v8, %v209_v15  ;;  %v239_v19 = vadd.f32 %v238_v18, %v209_v15  ;;  %v1206_v18 = vmov 64.0  }
 0x12f   :  { %v241_v21 = vmul.f32 0.2, %v236_v17  ;;  %v242_v24 = vmul.f32 0.2, %v239_v19 }
 0x131   :  { %v243_v23 = vmax.f32 %v236_v17, %v241_v21  ;;  %v244_v28 = vmax.f32 %v239_v19, %v242_v24 }
 0x133   :  { %v245_v26 = vadd.f32 %v243_v23, %v1587_v22  ;;  %v246_v32 = vadd.f32 %v244_v28, %v1593_v30 }
 0x135   :  { %247 = vmax.xlane.f32.xlu0 %v245_v26 }
 0x13d   :  { %249 = vmax.xlane.f32.xlu0 %v246_v32 }
 0x1a8   :  { %v248_v48 = vpop.xlane.xlu0 %247 }
 0x1a9   :  { %v251_v50 = vsub.f32 %v245_v26, %v248_v48 }
 0x1ab   :  { %v253_v52 = vmul.f32 1.442695, %v251_v50 }
 0x1ad   :  { %1143 = vpow2.f32 %v253_v52  ;;  %v431_v52 = vld [vmem:[%s2014_s13 + $0x38] sm:$0xff] }
 0x1ae   :  { %450 = vmatpush.msrb.mxu2 %v431_v52 }
 0x1b0   :  { %v250_v54 = vpop.xlane.xlu0 %249 }
 0x1b1   :  { %v252_v56 = vsub.f32 %v246_v32, %v250_v54  ;;  %v430_v54 = vld [vmem:[%s2014_s13 + $0x30] sm:$0xff] }
 0x1b2   :  { %451 = vmatpush.msrb.mxu2 %v430_v54  ;;  %v1135_v54 = vld [vmem:[%s2012_s12] ss:$0 sm:$0xff] }
 0x1b3   :  { %v1144_v58 = vpop.eup %1143  ;;  %v255_v61 = vmul.f32 1.442695, %v252_v56  ;;  %v429_v56 = vld [vmem:[%s2014_s13 + $0x28] sm:$0xff] }
 0x1b4   :  { %v257_v62 = vmul.f32 %v1144_v58, %v1629_v57  ;;  %452 = vmatpush.msrb.mxu2 %v429_v56  ;;  %v428_v58 = vld [vmem:[%s2014_s13 + $0x20] sm:$0xff] }
 0x1b5   :  { %1145 = vpow2.f32 %v255_v61  ;;  %v427_v61 = vld [vmem:[%s2014_s13 + $0x18] sm:$0xff] }
 0x1b6   :  { %275 = vmatmul.f32.vlgmr.msra.gmra.mxu3 %v257_v62  ;;  %453 = vmatpush.msrb.mxu2 %v428_v58 }
 0x1b7   :  { %853 = vmatpush.msra.mxu3 %v1533_v0 }
 0x1b8   :  { %454 = vmatpush.msrb.mxu2 %v427_v61 }
 0x1b9   :  { %854 = vmatpush.msra.mxu3 %v1538_v1 }
 0x1bb   :  { %v1146_v2 = vpop.eup %1145  ;;  %855 = vmatpush.msra.mxu3 %v1544_v3 }
 0x1bc   :  { %v258_v4 = vmul.f32 %v1146_v2, %v1636_v63  ;;  %v425_v2 = vld [vmem:[%s2014_s13 + $0x8] sm:$0xff] }
 0x1bd   :  { %856 = vmatpush.msra.mxu3 %v1550_v5 }
 0x1be   :  { %278 = vmatmul.f32.gmra.mxu3 %v258_v4 }
 0x1bf   :  { %857 = vmatpush.msra.mxu3 %v1556_v7 }
 0x1c1   :  { %858 = vmatpush.msra.mxu3 %v1562_v10 }
 0x1c3   :  { %859 = vmatpush.msra.mxu3 %v1568_v12 }
 0x1c5   :  { %860 = vmatpush.msra.mxu3 %v1574_v14 }
 0x1c7   :  { %861 = vmatpush.msra.mxu3 %v1580_v16 }
 0x1c9   :  { %862 = vmatpush.msra.mxu3 %v101_v34 }
 0x1cb   :  { %863 = vmatpush.msra.mxu3 %v100_v36 }
 0x1cd   :  { %864 = vmatpush.msra.mxu3 %v99_v38 }
 0x1cf   :  { %865 = vmatpush.msra.mxu3 %v98_v40 }
 0x1d1   :  { %866 = vmatpush.msra.mxu3 %v97_v42 }
 0x1d3   :  { %867 = vmatpush.msra.mxu3 %v96_v44 }
 0x1d5   :  { %868 = vmatpush.msra.mxu3 %v95_v46 }
 0x239   :  { %v276_v0 = vpop.f32.mrf.mxu3 }
 0x23a   :  { %vm282_vm2 = vcmp.gt.f32.partialorder %v276_v0, 0.0 }
 0x23b   :  { %v284_v1 = vsel %vm282_vm2, %v276_v0, 1.0 }
 0x23c   :  { %1147 = vrcp.f32 %v284_v1 }
 0x241   :  { %v279_v3 = vpop.f32.mrf.mxu3 }
 0x242   :  { %v1148_v5 = vpop.eup %1147  ;;  %vm283_vm4 = vcmp.gt.f32.partialorder %v279_v3, 0.0 }
 0x243   :  { %v285_v6 = vsel %vm283_vm4, %v279_v3, 1.0  ;;  %1112 = vmatmul.msk.f32.vlgmr.msra.gmra.mxu1 %vm288_vm3, %v1148_v5  ;;  %v472_v5 = vld [vmem:[%s2015_s15 + $0x38] sm:$0xff] }
 0x244   :  { %1149 = vrcp.f32 %v285_v6  ;;  %v518_v6 = vld [vmem:[%s2016_s16 + $0x38] sm:$0xff]  ;;  %487 = vmatpush.msra.mxu0 %v472_v5  ;;  %v465_v5 = vld [vmem:[%s2015_s15] sm:$0xff] }
 0x245   :  { %1151 = vrcp.f32 %v1206_v18  ;;  %v514_v18 = vld [vmem:[%s2016_s16 + $0x18] sm:$0xff] }
 0x24a   :  { %v1150_v7 = vpop.eup %1149 }
 0x24b   :  { %1113 = vmatmul.msk.f32.gmra.mxu1 %vm288_vm3, %v1150_v7  ;;  %v1152_v19 = vpop.eup %1151  ;;  %v471_v7 = vld [vmem:[%s2015_s15 + $0x30] sm:$0xff] }
 0x24c   :  { %v368_v21 = vmul.f32 64.0, %v1152_v19  ;;  %vm372_vm5 = vweird.f32 %v1152_v19  ;;  %488 = vmatpush.msra.mxu0 %v471_v7 }
 0x24e   :  { %v369_v23 = vsub.f32 1.0, %v368_v21  ;;  %v467_v21 = vld [vmem:[%s2015_s15 + $0x10] sm:$0xff] }
 0x250   :  { %v370_v24 = vmul.f32 %v1152_v19, %v369_v23  ;;  %v513_v23 = vld [vmem:[%s2016_s16 + $0x10] sm:$0xff] }
 0x252   :  { %v371_v26 = vadd.f32 %v1152_v19, %v370_v24 }
 0x254   :  { %v1651_v28 = vsel %vm372_vm5, %v1152_v19, %v371_v26  ;;  %v466_v26 = vld [vmem:[%s2015_s15 + $0x8] sm:$0xff] }
 0x2c0   :  { %v312_v8 = vpop.f32.mrf.mxu1 }
 0x2c1   :  { %v318_v9 = vmul.f32 %v312_v8, %v257_v62  ;;  %v426_v62 = vld [vmem:[%s2014_s13 + $0x10] sm:$0xff] }
 0x2c2   :  { %455 = vmatpush.msrb.mxu2 %v426_v62  ;;  %v517_v8 = vld [vmem:[%s2016_s16 + $0x30] sm:$0xff] }
 0x2c3   :  { %352 = vmatmul.f32.vlgmr.msrb.gmra.mxu1 %v318_v9  ;;  %v470_v9 = vld [vmem:[%s2015_s15 + $0x28] sm:$0xff] }
 0x2c4   :  { %456 = vmatpush.msrb.mxu2 %v425_v2  ;;  %489 = vmatpush.msra.mxu0 %v470_v9 }
 0x2c8   :  { %v315_v10 = vpop.f32.mrf.mxu1 }
 0x2c9   :  { %v319_v11 = vmul.f32 %v315_v10, %v258_v4  ;;  %v424_v4 = vld [vmem:[%s2014_s13] sm:$0xff]  ;;  %v516_v10 = vld [vmem:[%s2016_s16 + $0x28] sm:$0xff] }
 0x2ca   :  { %457 = vmatpush.msrb.mxu2 %v424_v4 }
 0x2cb   :  { %355 = vmatmul.f32.gmra.mxu1 %v319_v11 }
 0x2cc   :  { %527 = vmatpush.msra.mxu2 %v518_v6  ;;  %v511_v6 = vld [vmem:[%s2016_s16] sm:$0xff] }
 0x2ce   :  { %528 = vmatpush.msra.mxu2 %v517_v8 }
 0x2d0   :  { %529 = vmatpush.msra.mxu2 %v516_v10 }
 0x340   :  { %v353_v12 = vpop.f32.mrf.mxu1 }
 0x341   :  { %v359_v13 = vmax.f32 %v353_v12, 0.0 }
 0x343   :  { %v361_v14 = vsel %vm171_vm1, %v359_v13, 0.0 }
 0x344   :  { %362 = vadd.xlane.f32.xlu1 %v361_v14  ;;  %v515_v14 = vld [vmem:[%s2016_s16 + $0x20] sm:$0xff] }
 0x345   :  { %530 = vmatpush.msra.mxu2 %v515_v14 }
 0x347   :  { %531 = vmatpush.msra.mxu2 %v514_v18 }
 0x348   :  { %v356_v15 = vpop.f32.mrf.mxu1 }
 0x349   :  { %v360_v16 = vmax.f32 %v356_v15, 0.0  ;;  %532 = vmatpush.msra.mxu2 %v513_v23 }
 0x34b   :  { %v364_v17 = vsel %vm171_vm1, %v360_v16, 0.0 }
 0x34c   :  { %365 = vadd.xlane.f32.xlu1 %v364_v17  ;;  %v468_v17 = vld [vmem:[%s2015_s15 + $0x18] sm:$0xff] }
 0x3b7   :  { %v363_v32 = vpop.xlane.xlu1 %362 }
 0x3b8   :  { %v374_v34 = vmul.f32 %v1651_v28, %v363_v32 }
 0x3ba   :  { %v1654_v36 = vsub.f32 %v359_v13, %v374_v34  ;;  %v469_v13 = vld [vmem:[%s2015_s15 + $0x20] sm:$0xff] }
 0x3bb   :  { %490 = vmatpush.msra.mxu0 %v469_v13 }
 0x3bc   :  { %v378_v38 = vmul.f32 %v1654_v36, %v1654_v36 }
 0x3bd   :  { %491 = vmatpush.msra.mxu0 %v468_v17 }
 0x3be   :  { %v380_v40 = vsel %vm171_vm1, %v378_v38, 0.0 }
 0x3bf   :  { %381 = vadd.xlane.f32.xlu2 %v380_v40  ;;  %v366_v42 = vpop.xlane.xlu1 %365  ;;  %492 = vmatpush.msra.mxu0 %v467_v21 }
 0x3c0   :  { %v375_v44 = vmul.f32 %v1651_v28, %v366_v42 }
 0x3c1   :  { %493 = vmatpush.msra.mxu0 %v466_v26 }
 0x3c2   :  { %v1660_v46 = vsub.f32 %v360_v16, %v375_v44  ;;  %v1134_v44 = vld [vmem:[%s2061_s30] ss:$0 sm:$0xff] }
 0x3c3   :  { %494 = vmatpush.msra.mxu0 %v465_v5 }
 0x3c4   :  { %v379_v48 = vmul.f32 %v1660_v46, %v1660_v46 }
 0x3c5   :  { %610 = vmatpush.msrb.mxu0 %v1412_v20 }
 0x3c6   :  { %v383_v50 = vsel %vm171_vm1, %v379_v48, 0.0 }
 0x3c7   :  { %384 = vadd.xlane.f32.xlu2 %v383_v50 }
 0x432   :  { %v382_v0 = vpop.xlane.xlu2 %381 }
 0x433   :  { %v386_v1 = vmul.f32 %v382_v0, %v1651_v28 }
 0x435   :  { %v388_v3 = vadd.f32 1e-05, %v386_v1 }
 0x437   :  { %1153 = vrsqrt.f32 %v388_v3  ;;  %vm396_vm7 = vweird.f32 %v388_v3 }
 0x43a   :  { %v385_v11 = vpop.xlane.xlu2 %384 }
 0x43b   :  { %v387_v12 = vmul.f32 %v385_v11, %v1651_v28 }
 0x43d   :  { %v1154_v15 = vpop.eup %1153  ;;  %v389_v16 = vadd.f32 1e-05, %v387_v12 }
 0x43e   :  { %v391_v19 = vmul.f32 %v1154_v15, %v388_v3  ;;  %vm397_vm6 = vweird.f32 %v1154_v15 }
 0x43f   :  { %1155 = vrsqrt.f32 %v389_v16  ;;  %vm398_vm8 = vmor %vm396_vm7, %vm397_vm6  ;;  %vm406_vm10 = vweird.f32 %v389_v16 }
 0x440   :  { %v392_v24 = vmul.f32 %v1154_v15, %v391_v19 }
 0x442   :  { %v393_v32 = vmul.f32 0.5, %v392_v24 }
 0x444   :  { %v394_v34 = vsub.f32 1.5, %v393_v32 }
 0x445   :  { %v1156_v38 = vpop.eup %1155 }
 0x446   :  { %v395_v40 = vmul.f32 %v1154_v15, %v394_v34  ;;  %v401_v42 = vmul.f32 %v1156_v38, %v389_v16  ;;  %vm407_vm9 = vweird.f32 %v1156_v38 }
 0x447   :  { %vm408_vm11 = vmor %vm406_vm10, %vm407_vm9 }
 0x448   :  { %v399_v48 = vsel %vm398_vm8, %v1154_v15, %v395_v40  ;;  %v402_v50 = vmul.f32 %v1156_v38, %v401_v42 }
 0x449   :  { %v410_v52 = vmul.f32 %v399_v48, %v1654_v36  ;;  %v512_v36 = vld [vmem:[%s2016_s16 + $0x8] sm:$0xff] }
 0x44a   :  { %v403_v56 = vmul.f32 0.5, %v402_v50  ;;  %533 = vmatpush.msra.mxu2 %v512_v36 }
 0x44b   :  { %v416_v58 = vmul.f32 %v1134_v44, %v410_v52 }
 0x44c   :  { %v404_v61 = vsub.f32 1.5, %v403_v56  ;;  %534 = vmatpush.msra.mxu2 %v511_v6 }
 0x44d   :  { %v422_v62 = vadd.f32 %v1135_v54, %v416_v58 }
 0x44e   :  { %v405_v2 = vmul.f32 %v1156_v38, %v404_v61 }
 0x44f   :  { %1114 = vmatmul.msk.f32.vlgmr.msrb.gmra.mxu2 %vm171_vm1, %v422_v62 }
 0x450   :  { %v409_v4 = vsel %vm408_vm11, %v1156_v38, %v405_v2 }
 0x451   :  { %v411_v0 = vmul.f32 %v409_v4, %v1660_v46  ;;  %v1136_v46 = vld [vmem:[%s2013_s14] ss:$0 sm:$0xff] }
 0x453   :  { %v417_v1 = vmul.f32 %v1134_v44, %v411_v0 }
 0x455   :  { %v423_v3 = vadd.f32 %v1135_v54, %v417_v1 }
 0x457   :  { %1115 = vmatmul.msk.f32.gmra.mxu2 %vm171_vm1, %v423_v3 }
 0x4d2   :  { %v459_v7 = vpop.f32.mrf.mxu2 }
 0x4d3   :  { %v460_v8 = vadd.f32 %v1136_v46, %v459_v7 }
 0x4d5   :  { %1116 = vmatmul.msk.f32.vlgmr.msra.gmra.mxu0 %vm171_vm1, %v460_v8  ;;  %1118 = vmatmul.msk.f32.vlgmr.msra.gmra.mxu2 %vm171_vm1, %v460_v8  ;;  %v634_v20 = vmul.f32 %v460_v8, %v1428_v27  ;;  %v632_v13 = vmul.f32 %v460_v8, %v1442_v31  ;;  %v630_v15 = vmul.f32 %v460_v8, %v1454_v35 }
 0x4da   :  { %v462_v9 = vpop.f32.mrf.mxu2 }
 0x4db   :  { %v463_v10 = vadd.f32 %v1136_v46, %v462_v9 }
 0x4dd   :  { %1117 = vmatmul.msk.f32.gmra.mxu0 %vm171_vm1, %v463_v10  ;;  %1119 = vmatmul.msk.f32.gmra.mxu2 %vm171_vm1, %v463_v10  ;;  %v635_v11 = vmul.f32 %v463_v10, %v1423_v25  ;;  %v633_v12 = vmul.f32 %v463_v10, %v1436_v29  ;;  %v631_v14 = vmul.f32 %v463_v10, %v1448_v33 }
 0x4de   :  { %v629_v16 = vmul.f32 %v463_v10, %v1460_v37  ;;  %v628_v25 = vmul.f32 %v460_v8, %v1466_v39  ;;  %v627_v27 = vmul.f32 %v463_v10, %v1472_v41  ;;  %v626_v29 = vmul.f32 %v460_v8, %v1478_v43 }
 0x4df   :  { %636 = vmatpush.msra.mxu1 %v635_v11  ;;  %v625_v31 = vmul.f32 %v463_v10, %v1484_v45  ;;  %v624_v33 = vmul.f32 %v460_v8, %v1490_v47  ;;  %v623_v35 = vmul.f32 %v463_v10, %v1496_v49  ;;  %v622_v37 = vmul.f32 %v460_v8, %v1502_v51 }
 0x4e0   :  { %v621_v39 = vmul.f32 %v463_v10, %v1508_v53  ;;  %v620_v41 = vmul.f32 %v460_v8, %v1514_v55 }
 0x4e1   :  { %637 = vmatpush.msra.mxu1 %v634_v20 }
 0x4e3   :  { %638 = vmatpush.msra.mxu1 %v633_v12 }
 0x4e5   :  { %639 = vmatpush.msra.mxu1 %v632_v13 }
 0x4e7   :  { %640 = vmatpush.msra.mxu1 %v631_v14 }
 0x4e9   :  { %641 = vmatpush.msra.mxu1 %v630_v15 }
 0x4eb   :  { %642 = vmatpush.msra.mxu1 %v629_v16 }
 0x4ed   :  { %643 = vmatpush.msra.mxu1 %v628_v25 }
 0x4ef   :  { %644 = vmatpush.msra.mxu1 %v627_v27 }
 0x4f1   :  { %645 = vmatpush.msra.mxu1 %v626_v29 }
 0x4f3   :  { %646 = vmatpush.msra.mxu1 %v625_v31 }
 0x4f5   :  { %647 = vmatpush.msra.mxu1 %v624_v33 }
 0x4f7   :  { %648 = vmatpush.msra.mxu1 %v623_v35 }
 0x4f9   :  { %649 = vmatpush.msra.mxu1 %v622_v37 }
 0x4fb   :  { %650 = vmatpush.msra.mxu1 %v621_v39 }
 0x4fd   :  { %651 = vmatpush.msra.mxu1 %v620_v41 }
 0x552   :  { %v496_v43 = vpop.f32.mrf.mxu0 }
 0x553   :  { %v502_v45 = vmul.f32 %v496_v43, %v1521_v59  ;;  %v724_v43 = vld [vmem:[%s2020_s19 + $0x38] sm:$0xff] }
 0x554   :  { %743 = vmatpush.msrb.mxu2 %v724_v43 }
 0x558   :  { %v536_v21 = vpop.f32.mrf.mxu2 }
 0x55a   :  { %v499_v17 = vpop.f32.mrf.mxu0 }
 0x55b   :  { %v503_v18 = vmul.f32 %v499_v17, %v1526_v60  ;;  %v723_v17 = vld [vmem:[%s2020_s19 + $0x30] sm:$0xff] }
 0x55c   :  { %744 = vmatpush.msrb.mxu2 %v723_v17  ;;  %v1190_v17 = vld [vmem:[%s2056_s7 + $0x78] sm:$0xff] }
 0x55d   :  { %v504_v47 = vadd.f32 %v503_v18, %v502_v45  ;;  %v722_v45 = vld [vmem:[%s2020_s19 + $0x28] sm:$0xff]  ;;  %v721_v18 = vld [vmem:[%s2020_s19 + $0x20] sm:$0xff] }
 0x55e   :  { %745 = vmatpush.msrb.mxu2 %v722_v45 }
 0x55f   :  { %v505_v19 = vrot.slane %v504_v47, 4 }
 0x560   :  { %v539_v32 = vpop.f32.mrf.mxu2  ;;  %746 = vmatpush.msrb.mxu2 %v721_v18  ;;  %v1191_v18 = vld [vmem:[%s2056_s7 + $0x70] sm:$0xff] }
 0x561   :  { %v506_v49 = vadd.f32 %v505_v19, %v504_v47  ;;  %v720_v47 = vld [vmem:[%s2020_s19 + $0x18] sm:$0xff]  ;;  %v719_v19 = vld [vmem:[%s2020_s19 + $0x10] sm:$0xff] }
 0x562   :  { %747 = vmatpush.msrb.mxu2 %v720_v47 }
 0x563   :  { %v507_v23 = vrot.slane %v506_v49, 2 }
 0x564   :  { %748 = vmatpush.msrb.mxu2 %v719_v19  ;;  %v1192_v19 = vld [vmem:[%s2056_s7 + $0x68] sm:$0xff] }
 0x565   :  { %v508_v24 = vadd.f32 %v507_v23, %v506_v49  ;;  %v717_v49 = vld [vmem:[%s2020_s19] sm:$0xff] }
 0x567   :  { %v509_v51 = vrot.slane %v508_v24, 1 }
 0x569   :  { %v510_v26 = vadd.f32 %v509_v51, %v508_v24 }
 0x56b   :  { %v537_v53 = vadd.f32 %v536_v21, %v510_v26  ;;  %v540_v34 = vadd.f32 %v539_v32, %v510_v26  ;;  %v718_v21 = vld [vmem:[%s2020_s19 + $0x8] sm:$0xff]  ;;  %v765_v26 = vld [vmem:[%s2021_s21 + $0x38] sm:$0xff] }
 0x56c   :  { %749 = vmatpush.msrb.mxu2 %v718_v21  ;;  %v811_v32 = vld [vmem:[%s2022_s22 + $0x38] sm:$0xff]  ;;  %780 = vmatpush.msra.mxu0 %v765_v26  ;;  %v1195_v26 = vld [vmem:[%s2056_s7 + $0x50] sm:$0xff] }
 0x56d   :  { %v543_v38 = vmul.f32 0.2, %v540_v34  ;;  %v542_v55 = vmul.f32 0.2, %v537_v53 }
 0x56e   :  { %750 = vmatpush.msrb.mxu2 %v717_v49  ;;  %v1193_v49 = vld [vmem:[%s2056_s7 + $0x60] sm:$0xff] }
 0x56f   :  { %v545_v40 = vmax.f32 %v540_v34, %v543_v38  ;;  %v544_v42 = vmax.f32 %v537_v53, %v542_v55  ;;  %v764_v53 = vld [vmem:[%s2021_s21 + $0x30] sm:$0xff]  ;;  %v763_v38 = vld [vmem:[%s2021_s21 + $0x28] sm:$0xff] }
 0x570   :  { %820 = vmatpush.msra.mxu2 %v811_v32  ;;  %v810_v34 = vld [vmem:[%s2022_s22 + $0x30] sm:$0xff]  ;;  %v809_v55 = vld [vmem:[%s2022_s22 + $0x28] sm:$0xff]  ;;  %781 = vmatpush.msra.mxu0 %v764_v53 }
 0x571   :  { %v547_v44 = vadd.f32 %v545_v40, %v1593_v30  ;;  %v546_v48 = vadd.f32 %v544_v42, %v1587_v22  ;;  %v1196_v53 = vld [vmem:[%s2056_s7 + $0x48] sm:$0xff] }
 0x572   :  { %821 = vmatpush.msra.mxu2 %v810_v34  ;;  %782 = vmatpush.msra.mxu0 %v763_v38  ;;  %v1197_v38 = vld [vmem:[%s2056_s7 + $0x40] sm:$0xff] }
 0x573   :  { %550 = vmax.xlane.f32.xlu1 %v547_v44  ;;  %548 = vmax.xlane.f32.xlu0 %v546_v48 }
 0x574   :  { %822 = vmatpush.msra.mxu2 %v809_v55 }
 0x5e6   :  { %v549_v50 = vpop.xlane.xlu0 %548  ;;  %v551_v52 = vpop.xlane.xlu1 %550 }
 0x5e7   :  { %v552_v54 = vsub.f32 %v546_v48, %v549_v50  ;;  %v553_v58 = vsub.f32 %v547_v44, %v551_v52  ;;  %v762_v44 = vld [vmem:[%s2021_s21 + $0x20] sm:$0xff] }
 0x5e8   :  { %v808_v48 = vld [vmem:[%s2022_s22 + $0x20] sm:$0xff]  ;;  %783 = vmatpush.msra.mxu0 %v762_v44  ;;  %v1199_v44 = vld [vmem:[%s2056_s7 + $0x30] sm:$0xff] }
 0x5e9   :  { %v554_v56 = vmul.f32 1.442695, %v552_v54  ;;  %v556_v61 = vmul.f32 1.442695, %v553_v58  ;;  %v761_v54 = vld [vmem:[%s2021_s21 + $0x18] sm:$0xff]  ;;  %823 = vmatpush.msra.mxu2 %v808_v48 }
 0x5ea   :  { %784 = vmatpush.msra.mxu0 %v761_v54  ;;  %v1201_v54 = vld [vmem:[%s2056_s7 + $0x20] sm:$0xff] }
 0x5eb   :  { %1157 = vpow2.f32 %v554_v56  ;;  %v807_v56 = vld [vmem:[%s2022_s22 + $0x18] sm:$0xff] }
 0x5ec   :  { %1159 = vpow2.f32 %v556_v61  ;;  %v760_v61 = vld [vmem:[%s2021_s21 + $0x10] sm:$0xff]  ;;  %824 = vmatpush.msra.mxu2 %v807_v56 }
 0x5ed   :  { %785 = vmatpush.msra.mxu0 %v760_v61 }
 0x5f1   :  { %v1158_v62 = vpop.eup %1157 }
 0x5f2   :  { %v558_v2 = vmul.f32 %v1158_v62, %v1629_v57  ;;  %v1160_v4 = vpop.eup %1159  ;;  %v806_v62 = vld [vmem:[%s2022_s22 + $0x10] sm:$0xff] }
 0x5f3   :  { %v559_v0 = vmul.f32 %v1160_v4, %v1636_v63  ;;  %v759_v4 = vld [vmem:[%s2021_s21 + $0x8] sm:$0xff]  ;;  %825 = vmatpush.msra.mxu2 %v806_v62  ;;  %v1203_v62 = vld [vmem:[%s2056_s7 + $0x10] sm:$0xff] }
 0x5f4   :  { %576 = vmatmul.f32.vlgmr.msrb.gmra.mxu3 %v558_v2  ;;  %786 = vmatpush.msra.mxu0 %v759_v4  ;;  %v1204_v4 = vld [vmem:[%s2056_s7 + $0x8] sm:$0xff] }
 0x5fc   :  { %579 = vmatmul.f32.gmra.mxu3 %v559_v0 }
 0x677   :  { %v577_v1 = vpop.f32.mrf.mxu3 }
 0x678   :  { %vm583_vm12 = vcmp.gt.f32.partialorder %v577_v1, 0.0 }
 0x679   :  { %v585_v3 = vsel %vm583_vm12, %v577_v1, 1.0 }
 0x67a   :  { %1161 = vrcp.f32 %v585_v3 }
 0x67f   :  { %v580_v36 = vpop.f32.mrf.mxu3 }
 0x680   :  { %v1162_v5 = vpop.eup %1161  ;;  %vm584_vm13 = vcmp.gt.f32.partialorder %v580_v36, 0.0 }
 0x681   :  { %v586_v6 = vsel %vm584_vm13, %v580_v36, 1.0  ;;  %1120 = vmatmul.msk.f32.vlgmr.msrb.gmra.mxu0 %vm288_vm3, %v1162_v5  ;;  %vm1051_vm13 = vcmask 23552  }
 0x682   :  { %1163 = vrcp.f32 %v586_v6  ;;  %v1137_v6 = vld [vmem:[%s2017_s17] ss:$0 sm:$0xff] }
 0x688   :  { %v1164_v46 = vpop.eup %1163 }
 0x689   :  { %1121 = vmatmul.msk.f32.gmra.mxu0 %vm288_vm3, %v1164_v46 }
 0x6fe   :  { %v612_v7 = vpop.f32.mrf.mxu0 }
 0x6ff   :  { %v618_v8 = vmul.f32 %v612_v7, %v558_v2 }
 0x701   :  { %652 = vmatmul.f32.vlgmr.msra.gmra.mxu1 %v618_v8 }
 0x706   :  { %v615_v9 = vpop.f32.mrf.mxu0 }
 0x707   :  { %v619_v10 = vmul.f32 %v615_v9, %v559_v0  ;;  %v1138_v9 = vld [vmem:[%s2018_s18] ss:$0 sm:$0xff] }
 0x709   :  { %655 = vmatmul.f32.gmra.mxu1 %v619_v10 }
 0x77e   :  { %v653_v11 = vpop.f32.mrf.mxu1 }
 0x77f   :  { %v659_v20 = vmax.f32 %v653_v11, 0.0 }
 0x781   :  { %v661_v12 = vsel %vm171_vm1, %v659_v20, 0.0 }
 0x782   :  { %662 = vadd.xlane.f32.xlu2 %v661_v12 }
 0x786   :  { %v656_v13 = vpop.f32.mrf.mxu1 }
 0x787   :  { %v660_v14 = vmax.f32 %v656_v13, 0.0 }
 0x789   :  { %v664_v15 = vsel %vm171_vm1, %v660_v14, 0.0 }
 0x78a   :  { %665 = vadd.xlane.f32.xlu0 %v664_v15 }
 0x7f5   :  { %v663_v16 = vpop.xlane.xlu2 %662 }
 0x7f6   :  { %v667_v25 = vmul.f32 %v663_v16, %v1651_v28 }
 0x7f8   :  { %v1784_v27 = vsub.f32 %v659_v20, %v667_v25 }
 0x7fa   :  { %v671_v29 = vmul.f32 %v1784_v27, %v1784_v27 }
 0x7fc   :  { %v673_v31 = vsel %vm171_vm1, %v671_v29, 0.0  ;;  %v758_v29 = vld [vmem:[%s2021_s21] sm:$0xff] }
 0x7fd   :  { %674 = vadd.xlane.f32.xlu1 %v673_v31  ;;  %v666_v33 = vpop.xlane.xlu0 %665  ;;  %v804_v31 = vld [vmem:[%s2022_s22] sm:$0xff]  ;;  %787 = vmatpush.msra.mxu0 %v758_v29 }
 0x7fe   :  { %v668_v35 = vmul.f32 %v666_v33, %v1651_v28  ;;  %v1189_v33 = vld [vmem:[%s2054_s28] sm:$0xff] }
 0x7ff   :  { %903 = vmatpush.msrb.mxu0 %v1189_v33 }
 0x800   :  { %v1790_v37 = vsub.f32 %v660_v14, %v668_v35  ;;  %v1139_v35 = vld [vmem:[%s2019_s20] ss:$0 sm:$0xff] }
 0x802   :  { %v672_v39 = vmul.f32 %v1790_v37, %v1790_v37 }
 0x804   :  { %v676_v41 = vsel %vm171_vm1, %v672_v39, 0.0 }
 0x805   :  { %677 = vadd.xlane.f32.xlu2 %v676_v41 }
 0x870   :  { %v675_v23 = vpop.xlane.xlu1 %674 }
 0x871   :  { %v679_v24 = vmul.f32 %v675_v23, %v1651_v28 }
 0x873   :  { %v681_v51 = vadd.f32 1e-05, %v679_v24  ;;  %v1194_v24 = vld [vmem:[%s2056_s7 + $0x58] sm:$0xff] }
 0x875   :  { %1165 = vrsqrt.f32 %v681_v51  ;;  %vm689_vm15 = vweird.f32 %v681_v51 }
 0x878   :  { %v678_v40 = vpop.xlane.xlu2 %677 }
 0x879   :  { %v680_v42 = vmul.f32 %v678_v40, %v1651_v28  ;;  %v1198_v40 = vld [vmem:[%s2056_s7 + $0x38] sm:$0xff] }
 0x87b   :  { %v1166_v50 = vpop.eup %1165  ;;  %v682_v52 = vadd.f32 1e-05, %v680_v42 }
 0x87c   :  { %v684_v58 = vmul.f32 %v1166_v50, %v681_v51  ;;  %vm690_vm14 = vweird.f32 %v1166_v50 }
 0x87d   :  { %1167 = vrsqrt.f32 %v682_v52  ;;  %vm691_vm0 = vmor %vm689_vm15, %vm690_vm14  ;;  %vm699_vm4 = vweird.f32 %v682_v52 }
 0x87e   :  { %v685_v2 = vmul.f32 %v1166_v50, %v684_v58  ;;  %v1202_v58 = vld [vmem:[%s2056_s7 + $0x18] sm:$0xff] }
 0x880   :  { %v686_v0 = vmul.f32 0.5, %v685_v2 }
 0x882   :  { %v687_v1 = vsub.f32 1.5, %v686_v0 }
 0x883   :  { %v1168_v3 = vpop.eup %1167 }
 0x884   :  { %v688_v36 = vmul.f32 %v1166_v50, %v687_v1  ;;  %v694_v5 = vmul.f32 %v1168_v3, %v682_v52  ;;  %vm700_vm2 = vweird.f32 %v1168_v3  ;;  %v1205_v1 = vld [vmem:[%s2056_s7] sm:$0xff] }
 0x885   :  { %vm701_vm5 = vmor %vm699_vm4, %vm700_vm2 }
 0x886   :  { %v692_v46 = vsel %vm691_vm0, %v1166_v50, %v688_v36  ;;  %v695_v7 = vmul.f32 %v1168_v3, %v694_v5  ;;  %v1200_v50 = vld [vmem:[%s2056_s7 + $0x28] sm:$0xff] }
 0x887   :  { %v703_v8 = vmul.f32 %v692_v46, %v1784_v27  ;;  %v805_v27 = vld [vmem:[%s2022_s22 + $0x8] sm:$0xff] }
 0x888   :  { %v696_v10 = vmul.f32 0.5, %v695_v7  ;;  %826 = vmatpush.msra.mxu2 %v805_v27 }
 0x889   :  { %v709_v11 = vmul.f32 %v1137_v6, %v703_v8 }
 0x88a   :  { %v697_v20 = vsub.f32 1.5, %v696_v10  ;;  %827 = vmatpush.msra.mxu2 %v804_v31 }
 0x88b   :  { %v715_v12 = vadd.f32 %v1138_v9, %v709_v11 }
 0x88c   :  { %v698_v13 = vmul.f32 %v1168_v3, %v697_v20 }
 0x88d   :  { %1122 = vmatmul.msk.f32.vlgmr.msrb.gmra.mxu2 %vm171_vm1, %v715_v12 }
 0x88e   :  { %v702_v14 = vsel %vm701_vm5, %v1168_v3, %v698_v13 }
 0x88f   :  { %v704_v15 = vmul.f32 %v702_v14, %v1790_v37 }
 0x891   :  { %v710_v16 = vmul.f32 %v1137_v6, %v704_v15 }
 0x893   :  { %v716_v25 = vadd.f32 %v1138_v9, %v710_v16 }
 0x895   :  { %1123 = vmatmul.msk.f32.gmra.mxu2 %vm171_vm1, %v716_v25 }
 0x910   :  { %v752_v37 = vpop.f32.mrf.mxu2 }
 0x911   :  { %v753_v39 = vadd.f32 %v1139_v35, %v752_v37 }
 0x913   :  { %1124 = vmatmul.msk.f32.vlgmr.msra.gmra.mxu0 %vm171_vm1, %v753_v39  ;;  %1126 = vmatmul.msk.f32.vlgmr.msra.gmra.mxu2 %vm171_vm1, %v753_v39  ;;  %v927_v47 = vmul.f32 %v1191_v18, %v753_v39  ;;  %v925_v23 = vmul.f32 %v1193_v49, %v753_v39  ;;  %v923_v32 = vmul.f32 %v1195_v26, %v753_v39 }
 0x914   :  { %v921_v55 = vmul.f32 %v1197_v38, %v753_v39  ;;  %v919_v48 = vmul.f32 %v1199_v44, %v753_v39  ;;  %v917_v56 = vmul.f32 %v1201_v54, %v753_v39  ;;  %v915_v2 = vmul.f32 %v1203_v62, %v753_v39  ;;  %v1017_v62 = vld [vmem:[%s2026_s25 + $0x38] sm:$0xff] }
 0x915   :  { %v913_v3 = vmul.f32 %v1205_v1, %v753_v39  ;;  %1036 = vmatpush.msrb.mxu2 %v1017_v62  ;;  %v1013_v1 = vld [vmem:[%s2026_s25 + $0x18] sm:$0xff] }
 0x918   :  { %v755_v41 = vpop.f32.mrf.mxu2 }
 0x919   :  { %v756_v43 = vadd.f32 %v1139_v35, %v755_v41 }
 0x91b   :  { %1125 = vmatmul.msk.f32.gmra.mxu0 %vm171_vm1, %v756_v43  ;;  %1127 = vmatmul.msk.f32.gmra.mxu2 %vm171_vm1, %v756_v43  ;;  %v928_v45 = vmul.f32 %v1190_v17, %v756_v43  ;;  %v926_v21 = vmul.f32 %v1192_v19, %v756_v43  ;;  %v924_v51 = vmul.f32 %v1194_v24, %v756_v43 }
 0x91c   :  { %v922_v34 = vmul.f32 %v1196_v53, %v756_v43  ;;  %v920_v42 = vmul.f32 %v1198_v40, %v756_v43  ;;  %v918_v52 = vmul.f32 %v1200_v50, %v756_v43  ;;  %v916_v61 = vmul.f32 %v1202_v58, %v756_v43 }
 0x91d   :  { %929 = vmatpush.msrb.mxu1 %v928_v45  ;;  %v914_v0 = vmul.f32 %v1204_v4, %v756_v43  ;;  %v1015_v4 = vld [vmem:[%s2026_s25 + $0x28] sm:$0xff] }
 0x91f   :  { %930 = vmatpush.msrb.mxu1 %v927_v47 }
 0x921   :  { %931 = vmatpush.msrb.mxu1 %v926_v21 }
 0x923   :  { %932 = vmatpush.msrb.mxu1 %v925_v23 }
 0x925   :  { %933 = vmatpush.msrb.mxu1 %v924_v51 }
 0x927   :  { %934 = vmatpush.msrb.mxu1 %v923_v32 }
 0x929   :  { %935 = vmatpush.msrb.mxu1 %v922_v34 }
 0x92b   :  { %936 = vmatpush.msrb.mxu1 %v921_v55 }
 0x92d   :  { %937 = vmatpush.msrb.mxu1 %v920_v42 }
 0x92f   :  { %938 = vmatpush.msrb.mxu1 %v919_v48 }
 0x931   :  { %939 = vmatpush.msrb.mxu1 %v918_v52 }
 0x933   :  { %940 = vmatpush.msrb.mxu1 %v917_v56 }
 0x935   :  { %941 = vmatpush.msrb.mxu1 %v916_v61 }
 0x937   :  { %942 = vmatpush.msrb.mxu1 %v915_v2  ;;  %v1016_v2 = vld [vmem:[%s2026_s25 + $0x30] sm:$0xff] }
 0x938   :  { %1037 = vmatpush.msrb.mxu2 %v1016_v2 }
 0x939   :  { %943 = vmatpush.msrb.mxu1 %v914_v0  ;;  %v1014_v0 = vld [vmem:[%s2026_s25 + $0x20] sm:$0xff] }
 0x93a   :  { %1038 = vmatpush.msrb.mxu2 %v1015_v4 }
 0x93b   :  { %944 = vmatpush.msrb.mxu1 %v913_v3  ;;  %v1012_v3 = vld [vmem:[%s2026_s25 + $0x10] sm:$0xff] }
 0x93c   :  { %1039 = vmatpush.msrb.mxu2 %v1014_v0 }
 0x93e   :  { %1040 = vmatpush.msrb.mxu2 %v1013_v1 }
 0x940   :  { %1041 = vmatpush.msrb.mxu2 %v1012_v3 }
 0x990   :  { %v789_v36 = vpop.f32.mrf.mxu0 }
 0x991   :  { %v795_v6 = vmul.f32 %v789_v36, %v1521_v59  ;;  %v1011_v36 = vld [vmem:[%s2026_s25 + $0x8] sm:$0xff] }
 0x992   :  { %1042 = vmatpush.msrb.mxu2 %v1011_v36 }
 0x996   :  { %v829_v9 = vpop.f32.mrf.mxu2 }
 0x998   :  { %v792_v5 = vpop.f32.mrf.mxu0 }
 0x999   :  { %v796_v46 = vmul.f32 %v792_v5, %v1526_v60  ;;  %v1010_v5 = vld [vmem:[%s2026_s25] sm:$0xff] }
 0x99a   :  { %1043 = vmatpush.msrb.mxu2 %v1010_v5 }
 0x99b   :  { %v797_v7 = vadd.f32 %v796_v46, %v795_v6 }
 0x99d   :  { %v798_v8 = vrot.slane %v797_v7, 4 }
 0x99e   :  { %v832_v14 = vpop.f32.mrf.mxu2 }
 0x99f   :  { %v799_v10 = vadd.f32 %v798_v8, %v797_v7 }
 0x9a1   :  { %v800_v11 = vrot.slane %v799_v10, 2 }
 0x9a3   :  { %v801_v20 = vadd.f32 %v800_v11, %v799_v10 }
 0x9a5   :  { %v802_v12 = vrot.slane %v801_v20, 1 }
 0x9a7   :  { %v803_v13 = vadd.f32 %v802_v12, %v801_v20 }
 0x9a9   :  { %v830_v15 = vadd.f32 %v829_v9, %v803_v13  ;;  %v833_v16 = vadd.f32 %v832_v14, %v803_v13 }
 0x9ab   :  { %v836_v25 = vmul.f32 0.2, %v833_v16  ;;  %v835_v27 = vmul.f32 0.2, %v830_v15 }
 0x9ad   :  { %v838_v29 = vmax.f32 %v833_v16, %v836_v25  ;;  %v837_v31 = vmax.f32 %v830_v15, %v835_v27  ;;  %v1140_v27 = vld [vmem:[%s2023_s23] ss:$0 sm:$0xff] }
 0x9af   :  { %v840_v33 = vadd.f32 %v838_v29, %v1593_v30  ;;  %v839_v59 = vadd.f32 %v837_v31, %v1587_v22 }
 0x9b1   :  { %843 = vmax.xlane.f32.xlu1 %v840_v33  ;;  %841 = vmax.xlane.f32.xlu0 %v839_v59 }
 0xa24   :  { %v842_v60 = vpop.xlane.xlu0 %841  ;;  %v844_v35 = vpop.xlane.xlu1 %843 }
 0xa25   :  { %v845_v37 = vsub.f32 %v839_v59, %v842_v60  ;;  %v846_v41 = vsub.f32 %v840_v33, %v844_v35  ;;  %v1141_v33 = vld [vmem:[%s2024_s24] ss:$0 sm:$0xff] }
 0xa27   :  { %v847_v39 = vmul.f32 1.442695, %v845_v37  ;;  %v849_v43 = vmul.f32 1.442695, %v846_v41 }
 0xa29   :  { %1169 = vpow2.f32 %v847_v39 }
 0xa2a   :  { %1171 = vpow2.f32 %v849_v43 }
 0xa2f   :  { %v1170_v17 = vpop.eup %1169 }
 0xa30   :  { %v851_v45 = vmul.f32 %v1170_v17, %v1629_v57  ;;  %v1172_v18 = vpop.eup %1171 }
 0xa31   :  { %v852_v47 = vmul.f32 %v1172_v18, %v1636_v63  ;;  %v1142_v18 = vld [vmem:[%s2025_s26] ss:$0 sm:$0xff] }
 0xa32   :  { %869 = vmatmul.f32.vlgmr.msra.gmra.mxu3 %v851_v45 }
 0xa3a   :  { %872 = vmatmul.f32.gmra.mxu3 %v852_v47 }
 0xab5   :  { %v870_v30 = vpop.f32.mrf.mxu3 }
 0xab6   :  { %vm876_vm6 = vcmp.gt.f32.partialorder %v870_v30, 0.0 }
 0xab7   :  { %v878_v22 = vsel %vm876_vm6, %v870_v30, 1.0 }
 0xab8   :  { %1173 = vrcp.f32 %v878_v22 }
 0xabd   :  { %v873_v19 = vpop.f32.mrf.mxu3 }
 0xabe   :  { %v1174_v21 = vpop.eup %1173  ;;  %vm877_vm7 = vcmp.gt.f32.partialorder %v873_v19, 0.0 }
 0xabf   :  { %v879_v49 = vsel %vm877_vm7, %v873_v19, 1.0  ;;  %1128 = vmatmul.msk.f32.vlgmr.msrb.gmra.mxu0 %vm288_vm3, %v1174_v21 }
 0xac0   :  { %1175 = vrcp.f32 %v879_v49 }
 0xac6   :  { %v1176_v23 = vpop.eup %1175 }
 0xac7   :  { %1129 = vmatmul.msk.f32.gmra.mxu0 %vm288_vm3, %v1176_v23 }
 0xb3c   :  { %v905_v57 = vpop.f32.mrf.mxu0 }
 0xb3d   :  { %v911_v24 = vmul.f32 %v905_v57, %v851_v45 }
 0xb3f   :  { %945 = vmatmul.f32.vlgmr.msrb.gmra.mxu1 %v911_v24 }
 0xb44   :  { %v908_v51 = vpop.f32.mrf.mxu0 }
 0xb45   :  { %v912_v63 = vmul.f32 %v908_v51, %v852_v47 }
 0xb47   :  { %948 = vmatmul.f32.gmra.mxu1 %v912_v63 }
 0xbbc   :  { %v946_v26 = vpop.f32.mrf.mxu1 }
 0xbbd   :  { %v952_v32 = vmax.f32 %v946_v26, 0.0 }
 0xbbf   :  { %v954_v53 = vsel %vm171_vm1, %v952_v32, 0.0 }
 0xbc0   :  { %955 = vadd.xlane.f32.xlu2 %v954_v53 }
 0xbc4   :  { %v949_v34 = vpop.f32.mrf.mxu1 }
 0xbc5   :  { %v953_v38 = vmax.f32 %v949_v34, 0.0 }
 0xbc7   :  { %v957_v55 = vsel %vm171_vm1, %v953_v38, 0.0 }
 0xbc8   :  { %958 = vadd.xlane.f32.xlu0 %v957_v55 }
 0xc33   :  { %v956_v40 = vpop.xlane.xlu2 %955 }
 0xc34   :  { %v960_v42 = vmul.f32 %v956_v40, %v1651_v28 }
 0xc36   :  { %v962_v44 = vsub.f32 %v952_v32, %v960_v42 }
 0xc38   :  { %v964_v48 = vmul.f32 %v962_v44, %v962_v44 }
 0xc3a   :  { %v966_v50 = vsel %vm171_vm1, %v964_v48, 0.0 }
 0xc3b   :  { %967 = vadd.xlane.f32.xlu1 %v966_v50  ;;  %v959_v52 = vpop.xlane.xlu0 %958 }
 0xc3c   :  { %v961_v54 = vmul.f32 %v959_v52, %v1651_v28 }
 0xc3e   :  { %v963_v56 = vsub.f32 %v953_v38, %v961_v54 }
 0xc40   :  { %v965_v58 = vmul.f32 %v963_v56, %v963_v56 }
 0xc42   :  { %v969_v61 = vsel %vm171_vm1, %v965_v58, 0.0 }
 0xc43   :  { %970 = vadd.xlane.f32.xlu2 %v969_v61 }
 0xcae   :  { %v968_v6 = vpop.xlane.xlu1 %967 }
 0xcaf   :  { %v972_v46 = vmul.f32 %v968_v6, %v1651_v28 }
 0xcb1   :  { %v974_v7 = vadd.f32 1e-05, %v972_v46 }
 0xcb3   :  { %1177 = vrsqrt.f32 %v974_v7  ;;  %vm982_vm8 = vweird.f32 %v974_v7 }
 0xcb6   :  { %v971_v8 = vpop.xlane.xlu2 %970 }
 0xcb7   :  { %v973_v9 = vmul.f32 %v971_v8, %v1651_v28 }
 0xcb9   :  { %v1178_v10 = vpop.eup %1177  ;;  %v975_v11 = vadd.f32 1e-05, %v973_v9 }
 0xcba   :  { %v977_v20 = vmul.f32 %v1178_v10, %v974_v7  ;;  %vm983_vm3 = vweird.f32 %v1178_v10 }
 0xcbb   :  { %1179 = vrsqrt.f32 %v975_v11  ;;  %vm984_vm9 = vmor %vm982_vm8, %vm983_vm3  ;;  %vm992_vm11 = vweird.f32 %v975_v11 }
 0xcbc   :  { %v978_v12 = vmul.f32 %v1178_v10, %v977_v20 }
 0xcbe   :  { %v979_v13 = vmul.f32 0.5, %v978_v12 }
 0xcc0   :  { %v980_v14 = vsub.f32 1.5, %v979_v13 }
 0xcc1   :  { %v1180_v15 = vpop.eup %1179 }
 0xcc2   :  { %v981_v16 = vmul.f32 %v1178_v10, %v980_v14  ;;  %v987_v25 = vmul.f32 %v1180_v15, %v975_v11  ;;  %vm993_vm10 = vweird.f32 %v1180_v15 }
 0xcc3   :  { %vm994_vm12 = vmor %vm992_vm11, %vm993_vm10 }
 0xcc4   :  { %v985_v29 = vsel %vm984_vm9, %v1178_v10, %v981_v16  ;;  %v988_v31 = vmul.f32 %v1180_v15, %v987_v25 }
 0xcc5   :  { %v996_v28 = vmul.f32 %v985_v29, %v962_v44 }
 0xcc6   :  { %v989_v59 = vmul.f32 0.5, %v988_v31 }
 0xcc7   :  { %v1002_v60 = vmul.f32 %v1140_v27, %v996_v28 }
 0xcc8   :  { %v990_v35 = vsub.f32 1.5, %v989_v59 }
 0xcc9   :  { %v1008_v37 = vadd.f32 %v1141_v33, %v1002_v60 }
 0xcca   :  { %v991_v39 = vmul.f32 %v1180_v15, %v990_v35 }
 0xccb   :  { %1130 = vmatmul.msk.f32.vlgmr.msrb.gmra.mxu2 %vm171_vm1, %v1008_v37 }
 0xccc   :  { %v995_v41 = vsel %vm994_vm12, %v1180_v15, %v991_v39 }
 0xccd   :  { %v997_v43 = vmul.f32 %v995_v41, %v963_v56 }
 0xccf   :  { %v1003_v17 = vmul.f32 %v1140_v27, %v997_v43 }
 0xcd1   :  { %v1009_v45 = vadd.f32 %v1141_v33, %v1003_v17 }
 0xcd3   :  { %1131 = vmatmul.msk.f32.gmra.mxu2 %vm171_vm1, %v1009_v45 }
 0xd4e   :  { %v1045_v47 = vpop.f32.mrf.mxu2 }
 0xd4f   :  { %v1046_v30 = vadd.f32 %v1142_v18, %v1045_v47 }
 0xd51   :  { %v1052_v22 = vsel %vm1051_vm13, %v1046_v30, -inf }
 0xd52   :  { %1053 = vmax.xlane.f32.xlu0 %v1052_v22 }
 0xd56   :  { %v1048_v19 = vpop.f32.mrf.mxu2 }
 0xd57   :  { %v1049_v21 = vadd.f32 %v1142_v18, %v1048_v19 }
 0xd59   :  { %v1055_v49 = vsel %vm1051_vm13, %v1049_v21, -inf }
 0xd5a   :  { %1056 = vmax.xlane.f32.xlu1 %v1055_v49 }
 0xdc5   :  { %v1054_v23 = vpop.xlane.xlu0 %1053 }
 0xdc6   :  { %v1058_v57 = vsub.f32 %v1046_v30, %v1054_v23 }
 0xdc8   :  { %v1060_v24 = vmul.f32 1.442695, %v1058_v57 }
 0xdca   :  { %1181 = vpow2.f32 %v1060_v24 }
 0xdcd   :  { %v1057_v51 = vpop.xlane.xlu1 %1056 }
 0xdce   :  { %v1059_v63 = vsub.f32 %v1049_v21, %v1057_v51 }
 0xdd0   :  { %v1182_v26 = vpop.eup %1181  ;;  %v1062_v32 = vmul.f32 1.442695, %v1059_v63 }
 0xdd1   :  { %v1064_v53 = vsel %vm1051_vm13, %v1182_v26, 0.0 }
 0xdd2   :  { %1183 = vpow2.f32 %v1062_v32  ;;  %1065 = vadd.xlane.f32.xlu2 %v1064_v53 }
 0xdd8   :  { %v1184_v34 = vpop.eup %1183 }
 0xdd9   :  { %v1067_v38 = vsel %vm1051_vm13, %v1184_v34, 0.0 }
 0xdda   :  { %1068 = vadd.xlane.f32.xlu0 %v1067_v38 }
 0xe45   :  { %v1066_v55 = vpop.xlane.xlu2 %1065 }
 0xe46   :  { %1185 = vrcp.f32 %v1066_v55  ;;  %v1081_v50 = vand.u32 2147483648, %v1066_v55  ;;  %v1079_v54 = vand.u32 2147483647, %v1066_v55  ;;  %vm1075_vm14 = vweird.f32 %v1066_v55 }
 0xe48   :  { %v1082_v61 = vor.u32 1.1754944e-38, %v1081_v50  ;;  %vm1080_vm0 = vcmp.eq.f32.partialorder %v1079_v54, 8.507059e+37 }
 0xe4c   :  { %v1186_v40 = vpop.eup %1185 }
 0xe4d   :  { %v1071_v42 = vmul.f32 %v1186_v40, %v1066_v55  ;;  %v1069_v44 = vpop.xlane.xlu0 %1068  ;;  %vm1076_vm1 = vweird.f32 %v1186_v40 }
 0xe4e   :  { %1187 = vrcp.f32 %v1069_v44  ;;  %vm1077_vm15 = vmor %vm1075_vm14, %vm1076_vm1  ;;  %v1096_v3 = vand.u32 2147483648, %v1069_v44  ;;  %v1094_v5 = vand.u32 2147483647, %v1069_v44  ;;  %vm1090_vm4 = vweird.f32 %v1069_v44 }
 0xe4f   :  { %v1072_v48 = vsub.f32 1.0, %v1071_v42 }
 0xe50   :  { %v1097_v46 = vor.u32 1.1754944e-38, %v1096_v3  ;;  %vm1095_vm6 = vcmp.eq.f32.partialorder %v1094_v5, 8.507059e+37 }
 0xe51   :  { %v1073_v52 = vmul.f32 %v1186_v40, %v1072_v48 }
 0xe53   :  { %v1074_v56 = vadd.f32 %v1186_v40, %v1073_v52 }
 0xe54   :  { %v1188_v58 = vpop.eup %1187 }
 0xe55   :  { %v1078_v62 = vsel %vm1077_vm15, %v1186_v40, %v1074_v56  ;;  %v1086_v2 = vmul.f32 %v1188_v58, %v1069_v44  ;;  %vm1091_vm2 = vweird.f32 %v1188_v58 }
 0xe56   :  { %v1083_v4 = vsel %vm1080_vm0, %v1082_v61, %v1078_v62  ;;  %vm1092_vm5 = vmor %vm1090_vm4, %vm1091_vm2 }
 0xe57   :  { %v1084_v0 = vmul.f32 %v1182_v26, %v1083_v4  ;;  %v1087_v1 = vsub.f32 1.0, %v1086_v2 }
 0xe59   :  { %1100 = vst.msk [vmem:[%s2027_s27] sm:$0xff] %vm1051_vm13, %v1084_v0  ;;  %v1088_v36 = vmul.f32 %v1188_v58, %v1087_v1 }
 0xe5b   :  { %v1089_v6 = vadd.f32 %v1188_v58, %v1088_v36 }
 0xe5d   :  { %v1093_v7 = vsel %vm1092_vm5, %v1188_v58, %v1089_v6 }
 0xe5e   :  { %v1098_v8 = vsel %vm1095_vm6, %v1097_v46, %v1093_v7 }
 0xe5f   :  { %v1099_v9 = vmul.f32 %v1184_v34, %v1098_v8 }
 0xe61   :  { %1101 = vst.msk [vmem:[%s2027_s27 + $0x8] sm:$0xff] %vm1051_vm13, %v1099_v9 }

</bundles_post_ra>
